<compile_context>
chip_gen: v7x
topology: tpu7x:2x2x1
jax: 0.10.0
libtpu: 0.0.40
codegen_flags: <defaults>
</compile_context>

<pallas_src>
import jax
import jax.numpy as jnp
from jax.experimental import pallas as pl
from jax.experimental.pallas import tpu as pltpu

# ---------------- tiny GPT-2-like config (synthetic weights) ----------------
B = 2            # batch
T = 8            # sequence length
D = 32           # hidden size ("last_layer_size" for this synthetic model)
H = 4            # attention heads
DH = D // H      # head dim
NLAYER = 2       # transformer blocks
VOCAB = 50
VOCAB_PAD = 64   # pad vocab so the fused one-hot embedding matmul has a clean K
FFN = 4 * D
EPI_HID = 16
EPINET_PRIOR = 1.0
LN_EPS = 1e-5
W1F_N = 2 + 2 * EPI_HID   # fused head matmul-1 output width (= 34)


# ------------------------------ in-kernel math ------------------------------
def _layernorm(x, g, b, eps=LN_EPS):
    mu = jnp.mean(x, axis=-1, keepdims=True)
    var = jnp.mean((x - mu) ** 2, axis=-1, keepdims=True)
    return (x - mu) * jax.lax.rsqrt(var + eps) * g + b


def _gelu_new(x):
    # GPT-2 "gelu_new" (tanh approximation)
    c = 0.7978845608028654  # sqrt(2/pi)
    return 0.5 * x * (1.0 + jnp.tanh(c * (x + 0.044715 * x * x * x)))


# ---------------------- single fused forward-pass kernel ---------------------
def fused_forward_kernel(ids_ref, mask_ref, wte_ref, wpe_ref,
                         watt_ref, wfc_ref, wfc2_ref, vec_ref,
                         hw_ref, hvec_ref, out_ref):
    bf16 = jnp.bfloat16

    # ---- fused token-embedding lookup: one-hot(ids) @ wte, + positional ----
    ids = ids_ref[...]                                           # (B*T, 1) int32
    onehot = (jax.lax.broadcasted_iota(jnp.int32, (B * T, VOCAB_PAD), 1)
              == ids).astype(bf16)                               # (B*T, VOCAB_PAD)
    x = jnp.dot(onehot, wte_ref[...], preferred_element_type=jnp.float32)
    x = x + wpe_ref[...]                                         # (B*T, D) f32 residual

    # ---- additive attention bias (causal + HF key padding), built once, f32 ----
    mask = mask_ref[...]                                         # (B, T) in {0,1}
    row = jax.lax.broadcasted_iota(jnp.int32, (T, T), 0)
    col = jax.lax.broadcasted_iota(jnp.int32, (T, T), 1)
    causal = jnp.where(row >= col, 0.0, -1e9)[None, :, :]        # (1, T, T)
    bias = causal + ((mask - 1.0) * 1e9)[:, None, :]             # (B, T, T)

    # ---- transformer blocks, unrolled (weights stay VMEM-resident) ----
    for l in range(NLAYER):
        vec = vec_ref[l]                                         # (8, 128) f32 slab
        ln1g, ln1b = vec[0:1, :D], vec[1:2, :D]
        ln2g, ln2b = vec[2:3, :D], vec[3:4, :D]
        b_fc = vec[4:5, :]                                       # (1, FFN)
        b_attn_out = vec[5:6, :D]                                # folded bproj + bv@Wproj
        b_q, b_k = vec[6:7, :D], vec[6:7, D:2 * D]               # b_q pre-scaled
        b_fc2 = vec[7:8, :D]

        # LN1 + fused [V' | Q | K] projection (Wproj folded into V' offline)
        h = _layernorm(x, ln1g, ln1b)
        qkv = jnp.dot(h.astype(bf16), watt_ref[l],
                      preferred_element_type=jnp.float32)        # (B*T, H*D + 2D)
        q_all = qkv[:, H * D:H * D + D] + b_q                    # (B*T, D), scale folded
        k_all = qkv[:, H * D + D:] + b_k                         # (B*T, D)

        # multi-head attention: the output projection is already folded into the
        # pre-projected values, so per-head results simply accumulate (no K=8
        # projection matmuls, no VMEM scratch, no concat).
        attn = jnp.zeros((B * T, D), jnp.float32)
        for hh in range(H):
            qh = q_all[:, hh * DH:(hh + 1) * DH].reshape(B, T, DH)
            kh = k_all[:, hh * DH:(hh + 1) * DH].reshape(B, T, DH)
            vh = qkv[:, hh * D:(hh + 1) * D].reshape(B, T, D)    # pre-projected values
            s = jnp.einsum('bqd,bkd->bqk', qh.astype(bf16), kh.astype(bf16),
                           preferred_element_type=jnp.float32) + bias
            s = s - jnp.max(s, axis=-1, keepdims=True)
            p = jnp.exp(s)
            p = p * pl.reciprocal(jnp.sum(p, axis=-1, keepdims=True), approx=True)
            oh = jnp.einsum('bqk,bkd->bqd', p.astype(bf16), vh.astype(bf16),
                            preferred_element_type=jnp.float32)
            attn = attn + oh.reshape(B * T, D)
        x = x + attn + b_attn_out                                # residual 1

        # LN2 + MLP
        h2 = _layernorm(x, ln2g, ln2b)
        f = _gelu_new(jnp.dot(h2.astype(bf16), wfc_ref[l],
                              preferred_element_type=jnp.float32) + b_fc)
        x = x + jnp.dot(f.astype(bf16), wfc2_ref[l],
                        preferred_element_type=jnp.float32) + b_fc2   # residual 2

    # ---- ln_f + last-token select (reference uses out[0][:, -1, :] literally) ----
    hvec = hvec_ref[...]                                         # (8, 128) f32 slab
    x_last = x.reshape(B, T, D)[:, T - 1, :]                     # (B, D)
    xn = _layernorm(x_last, hvec[0:1, :D], hvec[1:2, :D])        # x_til

    # ---- fused linear head + both epinets ----
    # z = xn @ [last_layer | learn_fc1 | prior_fc1]; then
    # relu(z[:, 2:]) @ [learn_fc2 ; prior*prior_fc2]  ==  out_learn + prior*out_prior
    hw_all = hw_ref[...]                                         # (D, W1F_N + 2) bf16
    z = jnp.dot(xn.astype(bf16), hw_all[:D, :W1F_N],
                preferred_element_type=jnp.float32) + hvec[2:3, :W1F_N]
    out_mean = z[:, :2]
    hidden = jnp.maximum(z[:, 2:], 0.0)                          # (B, 2*EPI_HID)
    out_epi = jnp.dot(hidden.astype(bf16), hw_all[:2 * EPI_HID, W1F_N:],
                      preferred_element_type=jnp.float32) + hvec[3:4, :2]
    out_ref[...] = out_mean + out_epi


# -------------------------------- wrapper ------------------------------------
def forward(input_ids, attention_mask, packed):
    ids = input_ids.reshape(B * T, 1).astype(jnp.int32)
    mask = attention_mask.astype(jnp.float32)
    ins = (ids, mask) + tuple(packed)
    vmem = pl.BlockSpec(memory_space=pltpu.MemorySpace.VMEM)
    return pl.pallas_call(
        fused_forward_kernel,
        out_shape=jax.ShapeDtypeStruct((B, 2), jnp.float32),
        in_specs=[vmem] * len(ins),
        out_specs=vmem,
    )(*ins)


# ----------------------------- deterministic init ----------------------------
def init_weights(key):
    ks = iter(jax.random.split(key, 64))

    def nrm(shape, std=0.02):
        return (jax.random.normal(next(ks), shape) * std).astype(jnp.float32)

    zeros = lambda *s: jnp.zeros(s, jnp.float32)
    ones = lambda *s: jnp.ones(s, jnp.float32)

    layers = []
    for _ in range(NLAYER):
        layers.append(dict(
            ln1_g=ones(D), ln1_b=zeros(D),
            attn_w=nrm((D, 3 * D)), attn_b=zeros(3 * D),      # c_attn (q,k,v)
            proj_w=nrm((D, D)), proj_b=zeros(D),              # c_proj
            ln2_g=ones(D), ln2_b=zeros(D),
            fc_w=nrm((D, FFN)), fc_b=zeros(FFN),
            fc2_w=nrm((FFN, D)), fc2_b=zeros(D),
        ))
    return dict(
        wte=nrm((VOCAB, D)), wpe=nrm((T, D), std=0.01),
        layers=layers,
        lnf_g=ones(D), lnf_b=zeros(D),
        head_w=nrm((D, 2)), head_b=zeros(2),                  # last_layer
        l_w1=nrm((D, EPI_HID)), l_b1=zeros(EPI_HID),          # learn_epinet
        l_w2=nrm((EPI_HID, 2)), l_b2=zeros(2),
        p_w1=nrm((D, EPI_HID)), p_b1=zeros(EPI_HID),          # prior_epinet
        p_w2=nrm((EPI_HID, 2)), p_b2=zeros(2),
    )


# ------------------- offline weight folding / slab packing -------------------
def pack_params(w):
    f32, bf16 = jnp.float32, jnp.bfloat16
    pad128 = lambda v: jnp.pad(v, (0, 128 - v.shape[0]))
    scale = 1.0 / (DH ** 0.5)

    w_att, w_fc, w_fc2, vec = [], [], [], []
    for lyr in w['layers']:
        Wc, bc = lyr['attn_w'], lyr['attn_b']
        Wq, Wk, Wv = Wc[:, :D], Wc[:, D:2 * D], Wc[:, 2 * D:]
        bq, bk, bv = bc[:D], bc[D:2 * D], bc[2 * D:]
        Wp, bp = lyr['proj_w'], lyr['proj_b']
        # fold the attention output projection into the per-head value weights
        Wv_fold = jnp.concatenate(
            [Wv[:, h * DH:(h + 1) * DH] @ Wp[h * DH:(h + 1) * DH, :] for h in range(H)],
            axis=1)                                               # (D, H*D)
        b_out = bp + sum(bv[h * DH:(h + 1) * DH] @ Wp[h * DH:(h + 1) * DH, :]
                         for h in range(H))                       # (D,)
        # fused [V' | Q*scale | K] projection weight
        w_att.append(jnp.concatenate([Wv_fold, Wq * scale, Wk], axis=1))  # (D, H*D+2D)
        w_fc.append(lyr['fc_w'])
        w_fc2.append(lyr['fc2_w'])
        vec.append(jnp.stack([
            pad128(lyr['ln1_g']), pad128(lyr['ln1_b']),
            pad128(lyr['ln2_g']), pad128(lyr['ln2_b']),
            pad128(lyr['fc_b']),
            pad128(b_out),
            pad128(jnp.concatenate([bq * scale, bk])),
            pad128(lyr['fc2_b']),
        ]))                                                       # (8, 128)

    # fused head: [last_layer | learn_fc1 | prior_fc1] and [learn_fc2 ; prior*prior_fc2]
    w1f = jnp.concatenate([w['head_w'], w['l_w1'], w['p_w1']], axis=1)        # (D, 34)
    b1f = jnp.concatenate([w['head_b'], w['l_b1'], w['p_b1']])                # (34,)
    w2f = jnp.concatenate([w['l_w2'], EPINET_PRIOR * w['p_w2']], axis=0)      # (2*EPI_HID, 2)
    b2f = w['l_b2'] + EPINET_PRIOR * w['p_b2']                                # (2,)
    rows = max(w1f.shape[0], w2f.shape[0])
    padr = lambda m: jnp.pad(m, ((0, rows - m.shape[0]), (0, 0)))
    head_w = jnp.concatenate([padr(w1f), padr(w2f)], axis=1).astype(bf16)     # (rows, 36)
    head_vec = jnp.stack([pad128(w['lnf_g']), pad128(w['lnf_b']),
                          pad128(b1f), pad128(b2f)]
                         + [jnp.zeros(128, f32)] * 4)                         # (8, 128)

    wte_p = jnp.pad(w['wte'], ((0, VOCAB_PAD - VOCAB), (0, 0)))               # (VOCAB_PAD, D)
    wpe_bt = jnp.tile(w['wpe'], (B, 1))                                       # (B*T, D)

    return (wte_p.astype(bf16),
            wpe_bt.astype(f32),
            jnp.stack(w_att).astype(bf16),       # (NLAYER, D, H*D+2D)
            jnp.stack(w_fc).astype(bf16),        # (NLAYER, D, FFN)
            jnp.stack(w_fc2).astype(bf16),       # (NLAYER, FFN, D)
            jnp.stack(vec).astype(f32),          # (NLAYER, 8, 128)
            head_w,                              # (32, 36) bf16
            head_vec.astype(f32))                # (8, 128)


# ---------------------------------- main --------------------------------------
if __name__ == "__main__":
    key = jax.random.PRNGKey(0)
    k_w, k_ids = jax.random.split(key)

    packed = pack_params(init_weights(k_w))
    input_ids = jax.random.randint(k_ids, (B, T), 0, VOCAB, dtype=jnp.int32)
    attention_mask = jnp.ones((B, T), jnp.int32).at[1, 2].set(0)   # one padded token

    out = jax.jit(forward)(input_ids, attention_mask, packed)
    out = jax.block_until_ready(out)
    assert out.shape == (B, 2) and out.dtype == jnp.float32
    assert bool(jnp.all(jnp.isfinite(out)))
    print("KERNEL_OK")
</pallas_src>

<mosaic_0001>
module attributes {stable_mosaic.version = 11 : i64} {
  func.func @fused_forward_kernel(%arg0: memref<16x1xi32, #tpu.memory_space<vmem>>, %arg1: memref<2x8xf32, #tpu.memory_space<vmem>>, %arg2: memref<64x32xbf16, #tpu.memory_space<vmem>>, %arg3: memref<16x32xf32, #tpu.memory_space<vmem>>, %arg4: memref<2x32x192xbf16, #tpu.memory_space<vmem>>, %arg5: memref<2x32x128xbf16, #tpu.memory_space<vmem>>, %arg6: memref<2x128x32xbf16, #tpu.memory_space<vmem>>, %arg7: memref<2x8x128xf32, #tpu.memory_space<vmem>>, %arg8: memref<32x36xbf16, #tpu.memory_space<vmem>>, %arg9: memref<8x128xf32, #tpu.memory_space<vmem>>, %arg10: memref<2x2xf32, #tpu.memory_space<vmem>>) attributes {dimension_semantics = [], scalar_prefetch = 0 : i64, scratch_operands = 0 : i64, tpu.core_type = #tpu.core_type<tc>} {
    %c0 = arith.constant 0 : index
    %c0_0 = arith.constant 0 : index
    %0 = vector.load %arg0[%c0, %c0_0] : memref<16x1xi32, #tpu.memory_space<vmem>>, vector<16x1xi32>
    %1 = tpu.iota {dimensions = array<i32: 1>} : vector<16x64xi32>
    %2 = vector.broadcast %0 : vector<16x1xi32> to vector<16x64xi32>
    %3 = arith.cmpi eq, %1, %2 : vector<16x64xi32>
    %4 = arith.extui %3 : vector<16x64xi1> to vector<16x64xi32>
    %5 = arith.sitofp %4 : vector<16x64xi32> to vector<16x64xf32>
    %6 = arith.truncf %5 : vector<16x64xf32> to vector<16x64xbf16>
    %c0_1 = arith.constant 0 : index
    %c0_2 = arith.constant 0 : index
    %7 = vector.load %arg2[%c0_1, %c0_2] : memref<64x32xbf16, #tpu.memory_space<vmem>>, vector<64x32xbf16>
    %cst = arith.constant dense<0.000000e+00> : vector<16x32xf32>
    %8 = tpu.matmul %6, %7, %cst {dimension_numbers = #tpu.dot_dimension_numbers<[1], [0], [0], [1], [0, 0, 1, 1], [], []>} : vector<16x64xbf16>, vector<64x32xbf16>, vector<16x32xf32> -> vector<16x32xf32>
    %c0_3 = arith.constant 0 : index
    %c0_4 = arith.constant 0 : index
    %9 = vector.load %arg3[%c0_3, %c0_4] : memref<16x32xf32, #tpu.memory_space<vmem>>, vector<16x32xf32>
    %10 = arith.addf %8, %9 : vector<16x32xf32>
    %c0_5 = arith.constant 0 : index
    %c0_6 = arith.constant 0 : index
    %11 = vector.load %arg1[%c0_5, %c0_6] : memref<2x8xf32, #tpu.memory_space<vmem>>, vector<2x8xf32>
    %12 = tpu.iota {dimensions = array<i32: 0>} : vector<8x8xi32>
    %13 = tpu.iota {dimensions = array<i32: 1>} : vector<8x8xi32>
    %14 = arith.cmpi sge, %12, %13 : vector<8x8xi32>
    %cst_7 = arith.constant 0.000000e+00 : f32
    %cst_8 = arith.constant -1.000000e+09 : f32
    %15 = vector.broadcast %cst_7 : f32 to vector<8x8xf32>
    %16 = vector.broadcast %cst_8 : f32 to vector<8x8xf32>
    %17 = arith.select %14, %15, %16 : vector<8x8xi1>, vector<8x8xf32>
    %18 = vector.shape_cast %17 : vector<8x8xf32> to vector<1x8x8xf32>
    %cst_9 = arith.constant 1.000000e+00 : f32
    %19 = vector.broadcast %cst_9 : f32 to vector<2x8xf32>
    %20 = arith.subf %11, %19 : vector<2x8xf32>
    %cst_10 = arith.constant 1.000000e+09 : f32
    %21 = vector.broadcast %cst_10 : f32 to vector<2x8xf32>
    %22 = arith.mulf %20, %21 : vector<2x8xf32>
    %23 = vector.shape_cast %22 : vector<2x8xf32> to vector<2x1x8xf32>
    %24 = vector.broadcast %18 : vector<1x8x8xf32> to vector<2x8x8xf32>
    %25 = vector.broadcast %23 : vector<2x1x8xf32> to vector<2x8x8xf32>
    %26 = arith.addf %24, %25 : vector<2x8x8xf32>
    %c0_11 = arith.constant 0 : index
    %c0_12 = arith.constant 0 : index
    %c0_13 = arith.constant 0 : index
    %27 = vector.load %arg7[%c0_11, %c0_12, %c0_13] : memref<2x8x128xf32, #tpu.memory_space<vmem>>, vector<1x8x128xf32>
    %28 = vector.shape_cast %27 : vector<1x8x128xf32> to vector<8x128xf32>
    %29 = vector.extract_strided_slice %28 {offsets = [0, 0], sizes = [1, 32], strides = [1, 1]} : vector<8x128xf32> to vector<1x32xf32>
    %30 = vector.extract_strided_slice %28 {offsets = [1, 0], sizes = [1, 32], strides = [1, 1]} : vector<8x128xf32> to vector<1x32xf32>
    %31 = vector.extract_strided_slice %28 {offsets = [2, 0], sizes = [1, 32], strides = [1, 1]} : vector<8x128xf32> to vector<1x32xf32>
    %32 = vector.extract_strided_slice %28 {offsets = [3, 0], sizes = [1, 32], strides = [1, 1]} : vector<8x128xf32> to vector<1x32xf32>
    %33 = vector.extract_strided_slice %28 {offsets = [4, 0], sizes = [1, 128], strides = [1, 1]} : vector<8x128xf32> to vector<1x128xf32>
    %34 = vector.extract_strided_slice %28 {offsets = [5, 0], sizes = [1, 32], strides = [1, 1]} : vector<8x128xf32> to vector<1x32xf32>
    %35 = vector.extract_strided_slice %28 {offsets = [6, 0], sizes = [1, 32], strides = [1, 1]} : vector<8x128xf32> to vector<1x32xf32>
    %36 = vector.extract_strided_slice %28 {offsets = [6, 32], sizes = [1, 32], strides = [1, 1]} : vector<8x128xf32> to vector<1x32xf32>
    %37 = vector.extract_strided_slice %28 {offsets = [7, 0], sizes = [1, 32], strides = [1, 1]} : vector<8x128xf32> to vector<1x32xf32>
    %cst_14 = arith.constant dense<0.000000e+00> : vector<16xf32>
    %38 = vector.multi_reduction <add>, %10, %cst_14 [1] : vector<16x32xf32> to vector<16xf32>
    %39 = vector.shape_cast %38 : vector<16xf32> to vector<16x1xf32>
    %cst_15 = arith.constant 3.200000e+01 : f32
    %40 = vector.broadcast %cst_15 : f32 to vector<16x1xf32>
    %41 = arith.divf %39, %40 : vector<16x1xf32>
    %42 = vector.broadcast %41 : vector<16x1xf32> to vector<16x32xf32>
    %43 = arith.subf %10, %42 : vector<16x32xf32>
    %44 = arith.mulf %43, %43 : vector<16x32xf32>
    %cst_16 = arith.constant dense<0.000000e+00> : vector<16xf32>
    %45 = vector.multi_reduction <add>, %44, %cst_16 [1] : vector<16x32xf32> to vector<16xf32>
    %46 = vector.shape_cast %45 : vector<16xf32> to vector<16x1xf32>
    %cst_17 = arith.constant 3.200000e+01 : f32
    %47 = vector.broadcast %cst_17 : f32 to vector<16x1xf32>
    %48 = arith.divf %46, %47 : vector<16x1xf32>
    %49 = vector.broadcast %41 : vector<16x1xf32> to vector<16x32xf32>
    %50 = arith.subf %10, %49 : vector<16x32xf32>
    %cst_18 = arith.constant 9.99999974E-6 : f32
    %51 = vector.broadcast %cst_18 : f32 to vector<16x1xf32>
    %52 = arith.addf %48, %51 : vector<16x1xf32>
    %53 = math.rsqrt %52 : vector<16x1xf32>
    %54 = vector.broadcast %53 : vector<16x1xf32> to vector<16x32xf32>
    %55 = arith.mulf %50, %54 : vector<16x32xf32>
    %56 = vector.broadcast %29 : vector<1x32xf32> to vector<16x32xf32>
    %57 = arith.mulf %55, %56 : vector<16x32xf32>
    %58 = vector.broadcast %30 : vector<1x32xf32> to vector<16x32xf32>
    %59 = arith.addf %57, %58 : vector<16x32xf32>
    %60 = arith.truncf %59 : vector<16x32xf32> to vector<16x32xbf16>
    %c0_19 = arith.constant 0 : index
    %c0_20 = arith.constant 0 : index
    %c0_21 = arith.constant 0 : index
    %61 = vector.load %arg4[%c0_19, %c0_20, %c0_21] : memref<2x32x192xbf16, #tpu.memory_space<vmem>>, vector<1x32x192xbf16>
    %62 = vector.shape_cast %61 : vector<1x32x192xbf16> to vector<32x192xbf16>
    %cst_22 = arith.constant dense<0.000000e+00> : vector<16x192xf32>
    %63 = tpu.matmul %60, %62, %cst_22 {dimension_numbers = #tpu.dot_dimension_numbers<[1], [0], [0], [1], [0, 0, 1, 1], [], []>} : vector<16x32xbf16>, vector<32x192xbf16>, vector<16x192xf32> -> vector<16x192xf32>
    %64 = vector.extract_strided_slice %63 {offsets = [0, 128], sizes = [16, 32], strides = [1, 1]} : vector<16x192xf32> to vector<16x32xf32>
    %65 = vector.broadcast %35 : vector<1x32xf32> to vector<16x32xf32>
    %66 = arith.addf %64, %65 : vector<16x32xf32>
    %67 = vector.extract_strided_slice %63 {offsets = [0, 160], sizes = [16, 32], strides = [1, 1]} : vector<16x192xf32> to vector<16x32xf32>
    %68 = vector.broadcast %36 : vector<1x32xf32> to vector<16x32xf32>
    %69 = arith.addf %67, %68 : vector<16x32xf32>
    %cst_23 = arith.constant 0.000000e+00 : f32
    %70 = vector.broadcast %cst_23 : f32 to vector<16x32xf32>
    %71 = vector.extract_strided_slice %66 {offsets = [0, 0], sizes = [16, 8], strides = [1, 1]} : vector<16x32xf32> to vector<16x8xf32>
    %72 = vector.shape_cast %71 : vector<16x8xf32> to vector<2x8x8xf32>
    %73 = vector.extract_strided_slice %69 {offsets = [0, 0], sizes = [16, 8], strides = [1, 1]} : vector<16x32xf32> to vector<16x8xf32>
    %74 = vector.shape_cast %73 : vector<16x8xf32> to vector<2x8x8xf32>
    %75 = vector.extract_strided_slice %63 {offsets = [0, 0], sizes = [16, 32], strides = [1, 1]} : vector<16x192xf32> to vector<16x32xf32>
    %76 = vector.shape_cast %75 : vector<16x32xf32> to vector<2x8x32xf32>
    %77 = arith.truncf %72 : vector<2x8x8xf32> to vector<2x8x8xbf16>
    %78 = arith.truncf %74 : vector<2x8x8xf32> to vector<2x8x8xbf16>
    "tpu.trace_start"() <{level = 10 : i32, message = "bqd,bkd->bqk"}> : () -> ()
    %cst_24 = arith.constant dense<0.000000e+00> : vector<2x8x8xf32>
    %79 = tpu.matmul %77, %78, %cst_24 {dimension_numbers = #tpu.dot_dimension_numbers<[2], [2], [1], [1], [0, 0, 0, 1, 1, 1], [0], [0]>} : vector<2x8x8xbf16>, vector<2x8x8xbf16>, vector<2x8x8xf32> -> vector<2x8x8xf32>
    "tpu.trace_stop"() : () -> ()
    %80 = arith.addf %79, %26 : vector<2x8x8xf32>
    %cst_25 = arith.constant dense<0xFF800000> : vector<2x8xf32>
    %81 = vector.multi_reduction <maximumf>, %80, %cst_25 [2] : vector<2x8x8xf32> to vector<2x8xf32>
    %82 = vector.shape_cast %81 : vector<2x8xf32> to vector<2x8x1xf32>
    %83 = vector.broadcast %82 : vector<2x8x1xf32> to vector<2x8x8xf32>
    %84 = arith.subf %80, %83 : vector<2x8x8xf32>
    %85 = math.exp %84 : vector<2x8x8xf32>
    %cst_26 = arith.constant dense<0.000000e+00> : vector<2x8xf32>
    %86 = vector.multi_reduction <add>, %85, %cst_26 [2] : vector<2x8x8xf32> to vector<2x8xf32>
    %87 = vector.shape_cast %86 : vector<2x8xf32> to vector<2x8x1xf32>
    %88 = tpu.reciprocal %87 {approx = true} : vector<2x8x1xf32> -> vector<2x8x1xf32>
    %89 = vector.broadcast %88 : vector<2x8x1xf32> to vector<2x8x8xf32>
    %90 = arith.mulf %85, %89 : vector<2x8x8xf32>
    %91 = arith.truncf %90 : vector<2x8x8xf32> to vector<2x8x8xbf16>
    %92 = arith.truncf %76 : vector<2x8x32xf32> to vector<2x8x32xbf16>
    "tpu.trace_start"() <{level = 10 : i32, message = "bqk,bkd->bqd"}> : () -> ()
    %cst_27 = arith.constant dense<0.000000e+00> : vector<2x8x32xf32>
    %93 = tpu.matmul %91, %92, %cst_27 {dimension_numbers = #tpu.dot_dimension_numbers<[2], [1], [1], [2], [0, 0, 0, 1, 1, 2], [0], [0]>} : vector<2x8x8xbf16>, vector<2x8x32xbf16>, vector<2x8x32xf32> -> vector<2x8x32xf32>
    "tpu.trace_stop"() : () -> ()
    %94 = vector.shape_cast %93 : vector<2x8x32xf32> to vector<16x32xf32>
    %95 = arith.addf %70, %94 : vector<16x32xf32>
    %96 = vector.extract_strided_slice %66 {offsets = [0, 8], sizes = [16, 8], strides = [1, 1]} : vector<16x32xf32> to vector<16x8xf32>
    %97 = vector.shape_cast %96 : vector<16x8xf32> to vector<2x8x8xf32>
    %98 = vector.extract_strided_slice %69 {offsets = [0, 8], sizes = [16, 8], strides = [1, 1]} : vector<16x32xf32> to vector<16x8xf32>
    %99 = vector.shape_cast %98 : vector<16x8xf32> to vector<2x8x8xf32>
    %100 = vector.extract_strided_slice %63 {offsets = [0, 32], sizes = [16, 32], strides = [1, 1]} : vector<16x192xf32> to vector<16x32xf32>
    %101 = vector.shape_cast %100 : vector<16x32xf32> to vector<2x8x32xf32>
    %102 = arith.truncf %97 : vector<2x8x8xf32> to vector<2x8x8xbf16>
    %103 = arith.truncf %99 : vector<2x8x8xf32> to vector<2x8x8xbf16>
    "tpu.trace_start"() <{level = 10 : i32, message = "bqd,bkd->bqk"}> : () -> ()
    %cst_28 = arith.constant dense<0.000000e+00> : vector<2x8x8xf32>
    %104 = tpu.matmul %102, %103, %cst_28 {dimension_numbers = #tpu.dot_dimension_numbers<[2], [2], [1], [1], [0, 0, 0, 1, 1, 1], [0], [0]>} : vector<2x8x8xbf16>, vector<2x8x8xbf16>, vector<2x8x8xf32> -> vector<2x8x8xf32>
    "tpu.trace_stop"() : () -> ()
    %105 = arith.addf %104, %26 : vector<2x8x8xf32>
    %cst_29 = arith.constant dense<0xFF800000> : vector<2x8xf32>
    %106 = vector.multi_reduction <maximumf>, %105, %cst_29 [2] : vector<2x8x8xf32> to vector<2x8xf32>
    %107 = vector.shape_cast %106 : vector<2x8xf32> to vector<2x8x1xf32>
    %108 = vector.broadcast %107 : vector<2x8x1xf32> to vector<2x8x8xf32>
    %109 = arith.subf %105, %108 : vector<2x8x8xf32>
    %110 = math.exp %109 : vector<2x8x8xf32>
    %cst_30 = arith.constant dense<0.000000e+00> : vector<2x8xf32>
    %111 = vector.multi_reduction <add>, %110, %cst_30 [2] : vector<2x8x8xf32> to vector<2x8xf32>
    %112 = vector.shape_cast %111 : vector<2x8xf32> to vector<2x8x1xf32>
    %113 = tpu.reciprocal %112 {approx = true} : vector<2x8x1xf32> -> vector<2x8x1xf32>
    %114 = vector.broadcast %113 : vector<2x8x1xf32> to vector<2x8x8xf32>
    %115 = arith.mulf %110, %114 : vector<2x8x8xf32>
    %116 = arith.truncf %115 : vector<2x8x8xf32> to vector<2x8x8xbf16>
    %117 = arith.truncf %101 : vector<2x8x32xf32> to vector<2x8x32xbf16>
    "tpu.trace_start"() <{level = 10 : i32, message = "bqk,bkd->bqd"}> : () -> ()
    %cst_31 = arith.constant dense<0.000000e+00> : vector<2x8x32xf32>
    %118 = tpu.matmul %116, %117, %cst_31 {dimension_numbers = #tpu.dot_dimension_numbers<[2], [1], [1], [2], [0, 0, 0, 1, 1, 2], [0], [0]>} : vector<2x8x8xbf16>, vector<2x8x32xbf16>, vector<2x8x32xf32> -> vector<2x8x32xf32>
    "tpu.trace_stop"() : () -> ()
    %119 = vector.shape_cast %118 : vector<2x8x32xf32> to vector<16x32xf32>
    %120 = arith.addf %95, %119 : vector<16x32xf32>
    %121 = vector.extract_strided_slice %66 {offsets = [0, 16], sizes = [16, 8], strides = [1, 1]} : vector<16x32xf32> to vector<16x8xf32>
    %122 = vector.shape_cast %121 : vector<16x8xf32> to vector<2x8x8xf32>
    %123 = vector.extract_strided_slice %69 {offsets = [0, 16], sizes = [16, 8], strides = [1, 1]} : vector<16x32xf32> to vector<16x8xf32>
    %124 = vector.shape_cast %123 : vector<16x8xf32> to vector<2x8x8xf32>
    %125 = vector.extract_strided_slice %63 {offsets = [0, 64], sizes = [16, 32], strides = [1, 1]} : vector<16x192xf32> to vector<16x32xf32>
    %126 = vector.shape_cast %125 : vector<16x32xf32> to vector<2x8x32xf32>
    %127 = arith.truncf %122 : vector<2x8x8xf32> to vector<2x8x8xbf16>
    %128 = arith.truncf %124 : vector<2x8x8xf32> to vector<2x8x8xbf16>
    "tpu.trace_start"() <{level = 10 : i32, message = "bqd,bkd->bqk"}> : () -> ()
    %cst_32 = arith.constant dense<0.000000e+00> : vector<2x8x8xf32>
    %129 = tpu.matmul %127, %128, %cst_32 {dimension_numbers = #tpu.dot_dimension_numbers<[2], [2], [1], [1], [0, 0, 0, 1, 1, 1], [0], [0]>} : vector<2x8x8xbf16>, vector<2x8x8xbf16>, vector<2x8x8xf32> -> vector<2x8x8xf32>
    "tpu.trace_stop"() : () -> ()
    %130 = arith.addf %129, %26 : vector<2x8x8xf32>
    %cst_33 = arith.constant dense<0xFF800000> : vector<2x8xf32>
    %131 = vector.multi_reduction <maximumf>, %130, %cst_33 [2] : vector<2x8x8xf32> to vector<2x8xf32>
    %132 = vector.shape_cast %131 : vector<2x8xf32> to vector<2x8x1xf32>
    %133 = vector.broadcast %132 : vector<2x8x1xf32> to vector<2x8x8xf32>
    %134 = arith.subf %130, %133 : vector<2x8x8xf32>
    %135 = math.exp %134 : vector<2x8x8xf32>
    %cst_34 = arith.constant dense<0.000000e+00> : vector<2x8xf32>
    %136 = vector.multi_reduction <add>, %135, %cst_34 [2] : vector<2x8x8xf32> to vector<2x8xf32>
    %137 = vector.shape_cast %136 : vector<2x8xf32> to vector<2x8x1xf32>
    %138 = tpu.reciprocal %137 {approx = true} : vector<2x8x1xf32> -> vector<2x8x1xf32>
    %139 = vector.broadcast %138 : vector<2x8x1xf32> to vector<2x8x8xf32>
    %140 = arith.mulf %135, %139 : vector<2x8x8xf32>
    %141 = arith.truncf %140 : vector<2x8x8xf32> to vector<2x8x8xbf16>
    %142 = arith.truncf %126 : vector<2x8x32xf32> to vector<2x8x32xbf16>
    "tpu.trace_start"() <{level = 10 : i32, message = "bqk,bkd->bqd"}> : () -> ()
    %cst_35 = arith.constant dense<0.000000e+00> : vector<2x8x32xf32>
    %143 = tpu.matmul %141, %142, %cst_35 {dimension_numbers = #tpu.dot_dimension_numbers<[2], [1], [1], [2], [0, 0, 0, 1, 1, 2], [0], [0]>} : vector<2x8x8xbf16>, vector<2x8x32xbf16>, vector<2x8x32xf32> -> vector<2x8x32xf32>
    "tpu.trace_stop"() : () -> ()
    %144 = vector.shape_cast %143 : vector<2x8x32xf32> to vector<16x32xf32>
    %145 = arith.addf %120, %144 : vector<16x32xf32>
    %146 = vector.extract_strided_slice %66 {offsets = [0, 24], sizes = [16, 8], strides = [1, 1]} : vector<16x32xf32> to vector<16x8xf32>
    %147 = vector.shape_cast %146 : vector<16x8xf32> to vector<2x8x8xf32>
    %148 = vector.extract_strided_slice %69 {offsets = [0, 24], sizes = [16, 8], strides = [1, 1]} : vector<16x32xf32> to vector<16x8xf32>
    %149 = vector.shape_cast %148 : vector<16x8xf32> to vector<2x8x8xf32>
    %150 = vector.extract_strided_slice %63 {offsets = [0, 96], sizes = [16, 32], strides = [1, 1]} : vector<16x192xf32> to vector<16x32xf32>
    %151 = vector.shape_cast %150 : vector<16x32xf32> to vector<2x8x32xf32>
    %152 = arith.truncf %147 : vector<2x8x8xf32> to vector<2x8x8xbf16>
    %153 = arith.truncf %149 : vector<2x8x8xf32> to vector<2x8x8xbf16>
    "tpu.trace_start"() <{level = 10 : i32, message = "bqd,bkd->bqk"}> : () -> ()
    %cst_36 = arith.constant dense<0.000000e+00> : vector<2x8x8xf32>
    %154 = tpu.matmul %152, %153, %cst_36 {dimension_numbers = #tpu.dot_dimension_numbers<[2], [2], [1], [1], [0, 0, 0, 1, 1, 1], [0], [0]>} : vector<2x8x8xbf16>, vector<2x8x8xbf16>, vector<2x8x8xf32> -> vector<2x8x8xf32>
    "tpu.trace_stop"() : () -> ()
    %155 = arith.addf %154, %26 : vector<2x8x8xf32>
    %cst_37 = arith.constant dense<0xFF800000> : vector<2x8xf32>
    %156 = vector.multi_reduction <maximumf>, %155, %cst_37 [2] : vector<2x8x8xf32> to vector<2x8xf32>
    %157 = vector.shape_cast %156 : vector<2x8xf32> to vector<2x8x1xf32>
    %158 = vector.broadcast %157 : vector<2x8x1xf32> to vector<2x8x8xf32>
    %159 = arith.subf %155, %158 : vector<2x8x8xf32>
    %160 = math.exp %159 : vector<2x8x8xf32>
    %cst_38 = arith.constant dense<0.000000e+00> : vector<2x8xf32>
    %161 = vector.multi_reduction <add>, %160, %cst_38 [2] : vector<2x8x8xf32> to vector<2x8xf32>
    %162 = vector.shape_cast %161 : vector<2x8xf32> to vector<2x8x1xf32>
    %163 = tpu.reciprocal %162 {approx = true} : vector<2x8x1xf32> -> vector<2x8x1xf32>
    %164 = vector.broadcast %163 : vector<2x8x1xf32> to vector<2x8x8xf32>
    %165 = arith.mulf %160, %164 : vector<2x8x8xf32>
    %166 = arith.truncf %165 : vector<2x8x8xf32> to vector<2x8x8xbf16>
    %167 = arith.truncf %151 : vector<2x8x32xf32> to vector<2x8x32xbf16>
    "tpu.trace_start"() <{level = 10 : i32, message = "bqk,bkd->bqd"}> : () -> ()
    %cst_39 = arith.constant dense<0.000000e+00> : vector<2x8x32xf32>
    %168 = tpu.matmul %166, %167, %cst_39 {dimension_numbers = #tpu.dot_dimension_numbers<[2], [1], [1], [2], [0, 0, 0, 1, 1, 2], [0], [0]>} : vector<2x8x8xbf16>, vector<2x8x32xbf16>, vector<2x8x32xf32> -> vector<2x8x32xf32>
    "tpu.trace_stop"() : () -> ()
    %169 = vector.shape_cast %168 : vector<2x8x32xf32> to vector<16x32xf32>
    %170 = arith.addf %145, %169 : vector<16x32xf32>
    %171 = arith.addf %10, %170 : vector<16x32xf32>
    %172 = vector.broadcast %34 : vector<1x32xf32> to vector<16x32xf32>
    %173 = arith.addf %171, %172 : vector<16x32xf32>
    %cst_40 = arith.constant dense<0.000000e+00> : vector<16xf32>
    %174 = vector.multi_reduction <add>, %173, %cst_40 [1] : vector<16x32xf32> to vector<16xf32>
    %175 = vector.shape_cast %174 : vector<16xf32> to vector<16x1xf32>
    %cst_41 = arith.constant 3.200000e+01 : f32
    %176 = vector.broadcast %cst_41 : f32 to vector<16x1xf32>
    %177 = arith.divf %175, %176 : vector<16x1xf32>
    %178 = vector.broadcast %177 : vector<16x1xf32> to vector<16x32xf32>
    %179 = arith.subf %173, %178 : vector<16x32xf32>
    %180 = arith.mulf %179, %179 : vector<16x32xf32>
    %cst_42 = arith.constant dense<0.000000e+00> : vector<16xf32>
    %181 = vector.multi_reduction <add>, %180, %cst_42 [1] : vector<16x32xf32> to vector<16xf32>
    %182 = vector.shape_cast %181 : vector<16xf32> to vector<16x1xf32>
    %cst_43 = arith.constant 3.200000e+01 : f32
    %183 = vector.broadcast %cst_43 : f32 to vector<16x1xf32>
    %184 = arith.divf %182, %183 : vector<16x1xf32>
    %185 = vector.broadcast %177 : vector<16x1xf32> to vector<16x32xf32>
    %186 = arith.subf %173, %185 : vector<16x32xf32>
    %cst_44 = arith.constant 9.99999974E-6 : f32
    %187 = vector.broadcast %cst_44 : f32 to vector<16x1xf32>
    %188 = arith.addf %184, %187 : vector<16x1xf32>
    %189 = math.rsqrt %188 : vector<16x1xf32>
    %190 = vector.broadcast %189 : vector<16x1xf32> to vector<16x32xf32>
    %191 = arith.mulf %186, %190 : vector<16x32xf32>
    %192 = vector.broadcast %31 : vector<1x32xf32> to vector<16x32xf32>
    %193 = arith.mulf %191, %192 : vector<16x32xf32>
    %194 = vector.broadcast %32 : vector<1x32xf32> to vector<16x32xf32>
    %195 = arith.addf %193, %194 : vector<16x32xf32>
    %196 = arith.truncf %195 : vector<16x32xf32> to vector<16x32xbf16>
    %c0_45 = arith.constant 0 : index
    %c0_46 = arith.constant 0 : index
    %c0_47 = arith.constant 0 : index
    %197 = vector.load %arg5[%c0_45, %c0_46, %c0_47] : memref<2x32x128xbf16, #tpu.memory_space<vmem>>, vector<1x32x128xbf16>
    %198 = vector.shape_cast %197 : vector<1x32x128xbf16> to vector<32x128xbf16>
    %cst_48 = arith.constant dense<0.000000e+00> : vector<16x128xf32>
    %199 = tpu.matmul %196, %198, %cst_48 {dimension_numbers = #tpu.dot_dimension_numbers<[1], [0], [0], [1], [0, 0, 1, 1], [], []>} : vector<16x32xbf16>, vector<32x128xbf16>, vector<16x128xf32> -> vector<16x128xf32>
    %200 = vector.broadcast %33 : vector<1x128xf32> to vector<16x128xf32>
    %201 = arith.addf %199, %200 : vector<16x128xf32>
    %cst_49 = arith.constant 5.000000e-01 : f32
    %202 = vector.broadcast %cst_49 : f32 to vector<16x128xf32>
    %203 = arith.mulf %202, %201 : vector<16x128xf32>
    %cst_50 = arith.constant 4.471500e-02 : f32
    %204 = vector.broadcast %cst_50 : f32 to vector<16x128xf32>
    %205 = arith.mulf %204, %201 : vector<16x128xf32>
    %206 = arith.mulf %205, %201 : vector<16x128xf32>
    %207 = arith.mulf %206, %201 : vector<16x128xf32>
    %208 = arith.addf %201, %207 : vector<16x128xf32>
    %cst_51 = arith.constant 0.797884583 : f32
    %209 = vector.broadcast %cst_51 : f32 to vector<16x128xf32>
    %210 = arith.mulf %209, %208 : vector<16x128xf32>
    %211 = math.tanh %210 : vector<16x128xf32>
    %cst_52 = arith.constant 1.000000e+00 : f32
    %212 = vector.broadcast %cst_52 : f32 to vector<16x128xf32>
    %213 = arith.addf %212, %211 : vector<16x128xf32>
    %214 = arith.mulf %203, %213 : vector<16x128xf32>
    %215 = arith.truncf %214 : vector<16x128xf32> to vector<16x128xbf16>
    %c0_53 = arith.constant 0 : index
    %c0_54 = arith.constant 0 : index
    %c0_55 = arith.constant 0 : index
    %216 = vector.load %arg6[%c0_53, %c0_54, %c0_55] : memref<2x128x32xbf16, #tpu.memory_space<vmem>>, vector<1x128x32xbf16>
    %217 = vector.shape_cast %216 : vector<1x128x32xbf16> to vector<128x32xbf16>
    %cst_56 = arith.constant dense<0.000000e+00> : vector<16x32xf32>
    %218 = tpu.matmul %215, %217, %cst_56 {dimension_numbers = #tpu.dot_dimension_numbers<[1], [0], [0], [1], [0, 0, 1, 1], [], []>} : vector<16x128xbf16>, vector<128x32xbf16>, vector<16x32xf32> -> vector<16x32xf32>
    %219 = arith.addf %173, %218 : vector<16x32xf32>
    %220 = vector.broadcast %37 : vector<1x32xf32> to vector<16x32xf32>
    %221 = arith.addf %219, %220 : vector<16x32xf32>
    %c1 = arith.constant 1 : index
    %c0_57 = arith.constant 0 : index
    %c0_58 = arith.constant 0 : index
    %222 = vector.load %arg7[%c1, %c0_57, %c0_58] : memref<2x8x128xf32, #tpu.memory_space<vmem>>, vector<1x8x128xf32>
    %223 = vector.shape_cast %222 : vector<1x8x128xf32> to vector<8x128xf32>
    %224 = vector.extract_strided_slice %223 {offsets = [0, 0], sizes = [1, 32], strides = [1, 1]} : vector<8x128xf32> to vector<1x32xf32>
    %225 = vector.extract_strided_slice %223 {offsets = [1, 0], sizes = [1, 32], strides = [1, 1]} : vector<8x128xf32> to vector<1x32xf32>
    %226 = vector.extract_strided_slice %223 {offsets = [2, 0], sizes = [1, 32], strides = [1, 1]} : vector<8x128xf32> to vector<1x32xf32>
    %227 = vector.extract_strided_slice %223 {offsets = [3, 0], sizes = [1, 32], strides = [1, 1]} : vector<8x128xf32> to vector<1x32xf32>
    %228 = vector.extract_strided_slice %223 {offsets = [4, 0], sizes = [1, 128], strides = [1, 1]} : vector<8x128xf32> to vector<1x128xf32>
    %229 = vector.extract_strided_slice %223 {offsets = [5, 0], sizes = [1, 32], strides = [1, 1]} : vector<8x128xf32> to vector<1x32xf32>
    %230 = vector.extract_strided_slice %223 {offsets = [6, 0], sizes = [1, 32], strides = [1, 1]} : vector<8x128xf32> to vector<1x32xf32>
    %231 = vector.extract_strided_slice %223 {offsets = [6, 32], sizes = [1, 32], strides = [1, 1]} : vector<8x128xf32> to vector<1x32xf32>
    %232 = vector.extract_strided_slice %223 {offsets = [7, 0], sizes = [1, 32], strides = [1, 1]} : vector<8x128xf32> to vector<1x32xf32>
    %cst_59 = arith.constant dense<0.000000e+00> : vector<16xf32>
    %233 = vector.multi_reduction <add>, %221, %cst_59 [1] : vector<16x32xf32> to vector<16xf32>
    %234 = vector.shape_cast %233 : vector<16xf32> to vector<16x1xf32>
    %cst_60 = arith.constant 3.200000e+01 : f32
    %235 = vector.broadcast %cst_60 : f32 to vector<16x1xf32>
    %236 = arith.divf %234, %235 : vector<16x1xf32>
    %237 = vector.broadcast %236 : vector<16x1xf32> to vector<16x32xf32>
    %238 = arith.subf %221, %237 : vector<16x32xf32>
    %239 = arith.mulf %238, %238 : vector<16x32xf32>
    %cst_61 = arith.constant dense<0.000000e+00> : vector<16xf32>
    %240 = vector.multi_reduction <add>, %239, %cst_61 [1] : vector<16x32xf32> to vector<16xf32>
    %241 = vector.shape_cast %240 : vector<16xf32> to vector<16x1xf32>
    %cst_62 = arith.constant 3.200000e+01 : f32
    %242 = vector.broadcast %cst_62 : f32 to vector<16x1xf32>
    %243 = arith.divf %241, %242 : vector<16x1xf32>
    %244 = vector.broadcast %236 : vector<16x1xf32> to vector<16x32xf32>
    %245 = arith.subf %221, %244 : vector<16x32xf32>
    %cst_63 = arith.constant 9.99999974E-6 : f32
    %246 = vector.broadcast %cst_63 : f32 to vector<16x1xf32>
    %247 = arith.addf %243, %246 : vector<16x1xf32>
    %248 = math.rsqrt %247 : vector<16x1xf32>
    %249 = vector.broadcast %248 : vector<16x1xf32> to vector<16x32xf32>
    %250 = arith.mulf %245, %249 : vector<16x32xf32>
    %251 = vector.broadcast %224 : vector<1x32xf32> to vector<16x32xf32>
    %252 = arith.mulf %250, %251 : vector<16x32xf32>
    %253 = vector.broadcast %225 : vector<1x32xf32> to vector<16x32xf32>
    %254 = arith.addf %252, %253 : vector<16x32xf32>
    %255 = arith.truncf %254 : vector<16x32xf32> to vector<16x32xbf16>
    %c1_64 = arith.constant 1 : index
    %c0_65 = arith.constant 0 : index
    %c0_66 = arith.constant 0 : index
    %256 = vector.load %arg4[%c1_64, %c0_65, %c0_66] : memref<2x32x192xbf16, #tpu.memory_space<vmem>>, vector<1x32x192xbf16>
    %257 = vector.shape_cast %256 : vector<1x32x192xbf16> to vector<32x192xbf16>
    %cst_67 = arith.constant dense<0.000000e+00> : vector<16x192xf32>
    %258 = tpu.matmul %255, %257, %cst_67 {dimension_numbers = #tpu.dot_dimension_numbers<[1], [0], [0], [1], [0, 0, 1, 1], [], []>} : vector<16x32xbf16>, vector<32x192xbf16>, vector<16x192xf32> -> vector<16x192xf32>
    %259 = vector.extract_strided_slice %258 {offsets = [0, 128], sizes = [16, 32], strides = [1, 1]} : vector<16x192xf32> to vector<16x32xf32>
    %260 = vector.broadcast %230 : vector<1x32xf32> to vector<16x32xf32>
    %261 = arith.addf %259, %260 : vector<16x32xf32>
    %262 = vector.extract_strided_slice %258 {offsets = [0, 160], sizes = [16, 32], strides = [1, 1]} : vector<16x192xf32> to vector<16x32xf32>
    %263 = vector.broadcast %231 : vector<1x32xf32> to vector<16x32xf32>
    %264 = arith.addf %262, %263 : vector<16x32xf32>
    %cst_68 = arith.constant 0.000000e+00 : f32
    %265 = vector.broadcast %cst_68 : f32 to vector<16x32xf32>
    %266 = vector.extract_strided_slice %261 {offsets = [0, 0], sizes = [16, 8], strides = [1, 1]} : vector<16x32xf32> to vector<16x8xf32>
    %267 = vector.shape_cast %266 : vector<16x8xf32> to vector<2x8x8xf32>
    %268 = vector.extract_strided_slice %264 {offsets = [0, 0], sizes = [16, 8], strides = [1, 1]} : vector<16x32xf32> to vector<16x8xf32>
    %269 = vector.shape_cast %268 : vector<16x8xf32> to vector<2x8x8xf32>
    %270 = vector.extract_strided_slice %258 {offsets = [0, 0], sizes = [16, 32], strides = [1, 1]} : vector<16x192xf32> to vector<16x32xf32>
    %271 = vector.shape_cast %270 : vector<16x32xf32> to vector<2x8x32xf32>
    %272 = arith.truncf %267 : vector<2x8x8xf32> to vector<2x8x8xbf16>
    %273 = arith.truncf %269 : vector<2x8x8xf32> to vector<2x8x8xbf16>
    "tpu.trace_start"() <{level = 10 : i32, message = "bqd,bkd->bqk"}> : () -> ()
    %cst_69 = arith.constant dense<0.000000e+00> : vector<2x8x8xf32>
    %274 = tpu.matmul %272, %273, %cst_69 {dimension_numbers = #tpu.dot_dimension_numbers<[2], [2], [1], [1], [0, 0, 0, 1, 1, 1], [0], [0]>} : vector<2x8x8xbf16>, vector<2x8x8xbf16>, vector<2x8x8xf32> -> vector<2x8x8xf32>
    "tpu.trace_stop"() : () -> ()
    %275 = arith.addf %274, %26 : vector<2x8x8xf32>
    %cst_70 = arith.constant dense<0xFF800000> : vector<2x8xf32>
    %276 = vector.multi_reduction <maximumf>, %275, %cst_70 [2] : vector<2x8x8xf32> to vector<2x8xf32>
    %277 = vector.shape_cast %276 : vector<2x8xf32> to vector<2x8x1xf32>
    %278 = vector.broadcast %277 : vector<2x8x1xf32> to vector<2x8x8xf32>
    %279 = arith.subf %275, %278 : vector<2x8x8xf32>
    %280 = math.exp %279 : vector<2x8x8xf32>
    %cst_71 = arith.constant dense<0.000000e+00> : vector<2x8xf32>
    %281 = vector.multi_reduction <add>, %280, %cst_71 [2] : vector<2x8x8xf32> to vector<2x8xf32>
    %282 = vector.shape_cast %281 : vector<2x8xf32> to vector<2x8x1xf32>
    %283 = tpu.reciprocal %282 {approx = true} : vector<2x8x1xf32> -> vector<2x8x1xf32>
    %284 = vector.broadcast %283 : vector<2x8x1xf32> to vector<2x8x8xf32>
    %285 = arith.mulf %280, %284 : vector<2x8x8xf32>
    %286 = arith.truncf %285 : vector<2x8x8xf32> to vector<2x8x8xbf16>
    %287 = arith.truncf %271 : vector<2x8x32xf32> to vector<2x8x32xbf16>
    "tpu.trace_start"() <{level = 10 : i32, message = "bqk,bkd->bqd"}> : () -> ()
    %cst_72 = arith.constant dense<0.000000e+00> : vector<2x8x32xf32>
    %288 = tpu.matmul %286, %287, %cst_72 {dimension_numbers = #tpu.dot_dimension_numbers<[2], [1], [1], [2], [0, 0, 0, 1, 1, 2], [0], [0]>} : vector<2x8x8xbf16>, vector<2x8x32xbf16>, vector<2x8x32xf32> -> vector<2x8x32xf32>
    "tpu.trace_stop"() : () -> ()
    %289 = vector.shape_cast %288 : vector<2x8x32xf32> to vector<16x32xf32>
    %290 = arith.addf %265, %289 : vector<16x32xf32>
    %291 = vector.extract_strided_slice %261 {offsets = [0, 8], sizes = [16, 8], strides = [1, 1]} : vector<16x32xf32> to vector<16x8xf32>
    %292 = vector.shape_cast %291 : vector<16x8xf32> to vector<2x8x8xf32>
    %293 = vector.extract_strided_slice %264 {offsets = [0, 8], sizes = [16, 8], strides = [1, 1]} : vector<16x32xf32> to vector<16x8xf32>
    %294 = vector.shape_cast %293 : vector<16x8xf32> to vector<2x8x8xf32>
    %295 = vector.extract_strided_slice %258 {offsets = [0, 32], sizes = [16, 32], strides = [1, 1]} : vector<16x192xf32> to vector<16x32xf32>
    %296 = vector.shape_cast %295 : vector<16x32xf32> to vector<2x8x32xf32>
    %297 = arith.truncf %292 : vector<2x8x8xf32> to vector<2x8x8xbf16>
    %298 = arith.truncf %294 : vector<2x8x8xf32> to vector<2x8x8xbf16>
    "tpu.trace_start"() <{level = 10 : i32, message = "bqd,bkd->bqk"}> : () -> ()
    %cst_73 = arith.constant dense<0.000000e+00> : vector<2x8x8xf32>
    %299 = tpu.matmul %297, %298, %cst_73 {dimension_numbers = #tpu.dot_dimension_numbers<[2], [2], [1], [1], [0, 0, 0, 1, 1, 1], [0], [0]>} : vector<2x8x8xbf16>, vector<2x8x8xbf16>, vector<2x8x8xf32> -> vector<2x8x8xf32>
    "tpu.trace_stop"() : () -> ()
    %300 = arith.addf %299, %26 : vector<2x8x8xf32>
    %cst_74 = arith.constant dense<0xFF800000> : vector<2x8xf32>
    %301 = vector.multi_reduction <maximumf>, %300, %cst_74 [2] : vector<2x8x8xf32> to vector<2x8xf32>
    %302 = vector.shape_cast %301 : vector<2x8xf32> to vector<2x8x1xf32>
    %303 = vector.broadcast %302 : vector<2x8x1xf32> to vector<2x8x8xf32>
    %304 = arith.subf %300, %303 : vector<2x8x8xf32>
    %305 = math.exp %304 : vector<2x8x8xf32>
    %cst_75 = arith.constant dense<0.000000e+00> : vector<2x8xf32>
    %306 = vector.multi_reduction <add>, %305, %cst_75 [2] : vector<2x8x8xf32> to vector<2x8xf32>
    %307 = vector.shape_cast %306 : vector<2x8xf32> to vector<2x8x1xf32>
    %308 = tpu.reciprocal %307 {approx = true} : vector<2x8x1xf32> -> vector<2x8x1xf32>
    %309 = vector.broadcast %308 : vector<2x8x1xf32> to vector<2x8x8xf32>
    %310 = arith.mulf %305, %309 : vector<2x8x8xf32>
    %311 = arith.truncf %310 : vector<2x8x8xf32> to vector<2x8x8xbf16>
    %312 = arith.truncf %296 : vector<2x8x32xf32> to vector<2x8x32xbf16>
    "tpu.trace_start"() <{level = 10 : i32, message = "bqk,bkd->bqd"}> : () -> ()
    %cst_76 = arith.constant dense<0.000000e+00> : vector<2x8x32xf32>
    %313 = tpu.matmul %311, %312, %cst_76 {dimension_numbers = #tpu.dot_dimension_numbers<[2], [1], [1], [2], [0, 0, 0, 1, 1, 2], [0], [0]>} : vector<2x8x8xbf16>, vector<2x8x32xbf16>, vector<2x8x32xf32> -> vector<2x8x32xf32>
    "tpu.trace_stop"() : () -> ()
    %314 = vector.shape_cast %313 : vector<2x8x32xf32> to vector<16x32xf32>
    %315 = arith.addf %290, %314 : vector<16x32xf32>
    %316 = vector.extract_strided_slice %261 {offsets = [0, 16], sizes = [16, 8], strides = [1, 1]} : vector<16x32xf32> to vector<16x8xf32>
    %317 = vector.shape_cast %316 : vector<16x8xf32> to vector<2x8x8xf32>
    %318 = vector.extract_strided_slice %264 {offsets = [0, 16], sizes = [16, 8], strides = [1, 1]} : vector<16x32xf32> to vector<16x8xf32>
    %319 = vector.shape_cast %318 : vector<16x8xf32> to vector<2x8x8xf32>
    %320 = vector.extract_strided_slice %258 {offsets = [0, 64], sizes = [16, 32], strides = [1, 1]} : vector<16x192xf32> to vector<16x32xf32>
    %321 = vector.shape_cast %320 : vector<16x32xf32> to vector<2x8x32xf32>
    %322 = arith.truncf %317 : vector<2x8x8xf32> to vector<2x8x8xbf16>
    %323 = arith.truncf %319 : vector<2x8x8xf32> to vector<2x8x8xbf16>
    "tpu.trace_start"() <{level = 10 : i32, message = "bqd,bkd->bqk"}> : () -> ()
    %cst_77 = arith.constant dense<0.000000e+00> : vector<2x8x8xf32>
    %324 = tpu.matmul %322, %323, %cst_77 {dimension_numbers = #tpu.dot_dimension_numbers<[2], [2], [1], [1], [0, 0, 0, 1, 1, 1], [0], [0]>} : vector<2x8x8xbf16>, vector<2x8x8xbf16>, vector<2x8x8xf32> -> vector<2x8x8xf32>
    "tpu.trace_stop"() : () -> ()
    %325 = arith.addf %324, %26 : vector<2x8x8xf32>
    %cst_78 = arith.constant dense<0xFF800000> : vector<2x8xf32>
    %326 = vector.multi_reduction <maximumf>, %325, %cst_78 [2] : vector<2x8x8xf32> to vector<2x8xf32>
    %327 = vector.shape_cast %326 : vector<2x8xf32> to vector<2x8x1xf32>
    %328 = vector.broadcast %327 : vector<2x8x1xf32> to vector<2x8x8xf32>
    %329 = arith.subf %325, %328 : vector<2x8x8xf32>
    %330 = math.exp %329 : vector<2x8x8xf32>
    %cst_79 = arith.constant dense<0.000000e+00> : vector<2x8xf32>
    %331 = vector.multi_reduction <add>, %330, %cst_79 [2] : vector<2x8x8xf32> to vector<2x8xf32>
    %332 = vector.shape_cast %331 : vector<2x8xf32> to vector<2x8x1xf32>
    %333 = tpu.reciprocal %332 {approx = true} : vector<2x8x1xf32> -> vector<2x8x1xf32>
    %334 = vector.broadcast %333 : vector<2x8x1xf32> to vector<2x8x8xf32>
    %335 = arith.mulf %330, %334 : vector<2x8x8xf32>
    %336 = arith.truncf %335 : vector<2x8x8xf32> to vector<2x8x8xbf16>
    %337 = arith.truncf %321 : vector<2x8x32xf32> to vector<2x8x32xbf16>
    "tpu.trace_start"() <{level = 10 : i32, message = "bqk,bkd->bqd"}> : () -> ()
    %cst_80 = arith.constant dense<0.000000e+00> : vector<2x8x32xf32>
    %338 = tpu.matmul %336, %337, %cst_80 {dimension_numbers = #tpu.dot_dimension_numbers<[2], [1], [1], [2], [0, 0, 0, 1, 1, 2], [0], [0]>} : vector<2x8x8xbf16>, vector<2x8x32xbf16>, vector<2x8x32xf32> -> vector<2x8x32xf32>
    "tpu.trace_stop"() : () -> ()
    %339 = vector.shape_cast %338 : vector<2x8x32xf32> to vector<16x32xf32>
    %340 = arith.addf %315, %339 : vector<16x32xf32>
    %341 = vector.extract_strided_slice %261 {offsets = [0, 24], sizes = [16, 8], strides = [1, 1]} : vector<16x32xf32> to vector<16x8xf32>
    %342 = vector.shape_cast %341 : vector<16x8xf32> to vector<2x8x8xf32>
    %343 = vector.extract_strided_slice %264 {offsets = [0, 24], sizes = [16, 8], strides = [1, 1]} : vector<16x32xf32> to vector<16x8xf32>
    %344 = vector.shape_cast %343 : vector<16x8xf32> to vector<2x8x8xf32>
    %345 = vector.extract_strided_slice %258 {offsets = [0, 96], sizes = [16, 32], strides = [1, 1]} : vector<16x192xf32> to vector<16x32xf32>
    %346 = vector.shape_cast %345 : vector<16x32xf32> to vector<2x8x32xf32>
    %347 = arith.truncf %342 : vector<2x8x8xf32> to vector<2x8x8xbf16>
    %348 = arith.truncf %344 : vector<2x8x8xf32> to vector<2x8x8xbf16>
    "tpu.trace_start"() <{level = 10 : i32, message = "bqd,bkd->bqk"}> : () -> ()
    %cst_81 = arith.constant dense<0.000000e+00> : vector<2x8x8xf32>
    %349 = tpu.matmul %347, %348, %cst_81 {dimension_numbers = #tpu.dot_dimension_numbers<[2], [2], [1], [1], [0, 0, 0, 1, 1, 1], [0], [0]>} : vector<2x8x8xbf16>, vector<2x8x8xbf16>, vector<2x8x8xf32> -> vector<2x8x8xf32>
    "tpu.trace_stop"() : () -> ()
    %350 = arith.addf %349, %26 : vector<2x8x8xf32>
    %cst_82 = arith.constant dense<0xFF800000> : vector<2x8xf32>
    %351 = vector.multi_reduction <maximumf>, %350, %cst_82 [2] : vector<2x8x8xf32> to vector<2x8xf32>
    %352 = vector.shape_cast %351 : vector<2x8xf32> to vector<2x8x1xf32>
    %353 = vector.broadcast %352 : vector<2x8x1xf32> to vector<2x8x8xf32>
    %354 = arith.subf %350, %353 : vector<2x8x8xf32>
    %355 = math.exp %354 : vector<2x8x8xf32>
    %cst_83 = arith.constant dense<0.000000e+00> : vector<2x8xf32>
    %356 = vector.multi_reduction <add>, %355, %cst_83 [2] : vector<2x8x8xf32> to vector<2x8xf32>
    %357 = vector.shape_cast %356 : vector<2x8xf32> to vector<2x8x1xf32>
    %358 = tpu.reciprocal %357 {approx = true} : vector<2x8x1xf32> -> vector<2x8x1xf32>
    %359 = vector.broadcast %358 : vector<2x8x1xf32> to vector<2x8x8xf32>
    %360 = arith.mulf %355, %359 : vector<2x8x8xf32>
    %361 = arith.truncf %360 : vector<2x8x8xf32> to vector<2x8x8xbf16>
    %362 = arith.truncf %346 : vector<2x8x32xf32> to vector<2x8x32xbf16>
    "tpu.trace_start"() <{level = 10 : i32, message = "bqk,bkd->bqd"}> : () -> ()
    %cst_84 = arith.constant dense<0.000000e+00> : vector<2x8x32xf32>
    %363 = tpu.matmul %361, %362, %cst_84 {dimension_numbers = #tpu.dot_dimension_numbers<[2], [1], [1], [2], [0, 0, 0, 1, 1, 2], [0], [0]>} : vector<2x8x8xbf16>, vector<2x8x32xbf16>, vector<2x8x32xf32> -> vector<2x8x32xf32>
    "tpu.trace_stop"() : () -> ()
    %364 = vector.shape_cast %363 : vector<2x8x32xf32> to vector<16x32xf32>
    %365 = arith.addf %340, %364 : vector<16x32xf32>
    %366 = arith.addf %221, %365 : vector<16x32xf32>
    %367 = vector.broadcast %229 : vector<1x32xf32> to vector<16x32xf32>
    %368 = arith.addf %366, %367 : vector<16x32xf32>
    %cst_85 = arith.constant dense<0.000000e+00> : vector<16xf32>
    %369 = vector.multi_reduction <add>, %368, %cst_85 [1] : vector<16x32xf32> to vector<16xf32>
    %370 = vector.shape_cast %369 : vector<16xf32> to vector<16x1xf32>
    %cst_86 = arith.constant 3.200000e+01 : f32
    %371 = vector.broadcast %cst_86 : f32 to vector<16x1xf32>
    %372 = arith.divf %370, %371 : vector<16x1xf32>
    %373 = vector.broadcast %372 : vector<16x1xf32> to vector<16x32xf32>
    %374 = arith.subf %368, %373 : vector<16x32xf32>
    %375 = arith.mulf %374, %374 : vector<16x32xf32>
    %cst_87 = arith.constant dense<0.000000e+00> : vector<16xf32>
    %376 = vector.multi_reduction <add>, %375, %cst_87 [1] : vector<16x32xf32> to vector<16xf32>
    %377 = vector.shape_cast %376 : vector<16xf32> to vector<16x1xf32>
    %cst_88 = arith.constant 3.200000e+01 : f32
    %378 = vector.broadcast %cst_88 : f32 to vector<16x1xf32>
    %379 = arith.divf %377, %378 : vector<16x1xf32>
    %380 = vector.broadcast %372 : vector<16x1xf32> to vector<16x32xf32>
    %381 = arith.subf %368, %380 : vector<16x32xf32>
    %cst_89 = arith.constant 9.99999974E-6 : f32
    %382 = vector.broadcast %cst_89 : f32 to vector<16x1xf32>
    %383 = arith.addf %379, %382 : vector<16x1xf32>
    %384 = math.rsqrt %383 : vector<16x1xf32>
    %385 = vector.broadcast %384 : vector<16x1xf32> to vector<16x32xf32>
    %386 = arith.mulf %381, %385 : vector<16x32xf32>
    %387 = vector.broadcast %226 : vector<1x32xf32> to vector<16x32xf32>
    %388 = arith.mulf %386, %387 : vector<16x32xf32>
    %389 = vector.broadcast %227 : vector<1x32xf32> to vector<16x32xf32>
    %390 = arith.addf %388, %389 : vector<16x32xf32>
    %391 = arith.truncf %390 : vector<16x32xf32> to vector<16x32xbf16>
    %c1_90 = arith.constant 1 : index
    %c0_91 = arith.constant 0 : index
    %c0_92 = arith.constant 0 : index
    %392 = vector.load %arg5[%c1_90, %c0_91, %c0_92] : memref<2x32x128xbf16, #tpu.memory_space<vmem>>, vector<1x32x128xbf16>
    %393 = vector.shape_cast %392 : vector<1x32x128xbf16> to vector<32x128xbf16>
    %cst_93 = arith.constant dense<0.000000e+00> : vector<16x128xf32>
    %394 = tpu.matmul %391, %393, %cst_93 {dimension_numbers = #tpu.dot_dimension_numbers<[1], [0], [0], [1], [0, 0, 1, 1], [], []>} : vector<16x32xbf16>, vector<32x128xbf16>, vector<16x128xf32> -> vector<16x128xf32>
    %395 = vector.broadcast %228 : vector<1x128xf32> to vector<16x128xf32>
    %396 = arith.addf %394, %395 : vector<16x128xf32>
    %cst_94 = arith.constant 5.000000e-01 : f32
    %397 = vector.broadcast %cst_94 : f32 to vector<16x128xf32>
    %398 = arith.mulf %397, %396 : vector<16x128xf32>
    %cst_95 = arith.constant 4.471500e-02 : f32
    %399 = vector.broadcast %cst_95 : f32 to vector<16x128xf32>
    %400 = arith.mulf %399, %396 : vector<16x128xf32>
    %401 = arith.mulf %400, %396 : vector<16x128xf32>
    %402 = arith.mulf %401, %396 : vector<16x128xf32>
    %403 = arith.addf %396, %402 : vector<16x128xf32>
    %cst_96 = arith.constant 0.797884583 : f32
    %404 = vector.broadcast %cst_96 : f32 to vector<16x128xf32>
    %405 = arith.mulf %404, %403 : vector<16x128xf32>
    %406 = math.tanh %405 : vector<16x128xf32>
    %cst_97 = arith.constant 1.000000e+00 : f32
    %407 = vector.broadcast %cst_97 : f32 to vector<16x128xf32>
    %408 = arith.addf %407, %406 : vector<16x128xf32>
    %409 = arith.mulf %398, %408 : vector<16x128xf32>
    %410 = arith.truncf %409 : vector<16x128xf32> to vector<16x128xbf16>
    %c1_98 = arith.constant 1 : index
    %c0_99 = arith.constant 0 : index
    %c0_100 = arith.constant 0 : index
    %411 = vector.load %arg6[%c1_98, %c0_99, %c0_100] : memref<2x128x32xbf16, #tpu.memory_space<vmem>>, vector<1x128x32xbf16>
    %412 = vector.shape_cast %411 : vector<1x128x32xbf16> to vector<128x32xbf16>
    %cst_101 = arith.constant dense<0.000000e+00> : vector<16x32xf32>
    %413 = tpu.matmul %410, %412, %cst_101 {dimension_numbers = #tpu.dot_dimension_numbers<[1], [0], [0], [1], [0, 0, 1, 1], [], []>} : vector<16x128xbf16>, vector<128x32xbf16>, vector<16x32xf32> -> vector<16x32xf32>
    %414 = arith.addf %368, %413 : vector<16x32xf32>
    %415 = vector.broadcast %232 : vector<1x32xf32> to vector<16x32xf32>
    %416 = arith.addf %414, %415 : vector<16x32xf32>
    %c0_102 = arith.constant 0 : index
    %c0_103 = arith.constant 0 : index
    %417 = vector.load %arg9[%c0_102, %c0_103] : memref<8x128xf32, #tpu.memory_space<vmem>>, vector<8x128xf32>
    %418 = vector.shape_cast %416 : vector<16x32xf32> to vector<2x8x32xf32>
    %419 = vector.extract_strided_slice %418 {offsets = [0, 7, 0], sizes = [2, 1, 32], strides = [1, 1, 1]} : vector<2x8x32xf32> to vector<2x1x32xf32>
    %420 = vector.shape_cast %419 : vector<2x1x32xf32> to vector<2x32xf32>
    %421 = vector.extract_strided_slice %417 {offsets = [0, 0], sizes = [1, 32], strides = [1, 1]} : vector<8x128xf32> to vector<1x32xf32>
    %422 = vector.extract_strided_slice %417 {offsets = [1, 0], sizes = [1, 32], strides = [1, 1]} : vector<8x128xf32> to vector<1x32xf32>
    %cst_104 = arith.constant dense<0.000000e+00> : vector<2xf32>
    %423 = vector.multi_reduction <add>, %420, %cst_104 [1] : vector<2x32xf32> to vector<2xf32>
    %424 = vector.shape_cast %423 : vector<2xf32> to vector<2x1xf32>
    %cst_105 = arith.constant 3.200000e+01 : f32
    %425 = vector.broadcast %cst_105 : f32 to vector<2x1xf32>
    %426 = arith.divf %424, %425 : vector<2x1xf32>
    %427 = vector.broadcast %426 : vector<2x1xf32> to vector<2x32xf32>
    %428 = arith.subf %420, %427 : vector<2x32xf32>
    %429 = arith.mulf %428, %428 : vector<2x32xf32>
    %cst_106 = arith.constant dense<0.000000e+00> : vector<2xf32>
    %430 = vector.multi_reduction <add>, %429, %cst_106 [1] : vector<2x32xf32> to vector<2xf32>
    %431 = vector.shape_cast %430 : vector<2xf32> to vector<2x1xf32>
    %cst_107 = arith.constant 3.200000e+01 : f32
    %432 = vector.broadcast %cst_107 : f32 to vector<2x1xf32>
    %433 = arith.divf %431, %432 : vector<2x1xf32>
    %434 = vector.broadcast %426 : vector<2x1xf32> to vector<2x32xf32>
    %435 = arith.subf %420, %434 : vector<2x32xf32>
    %cst_108 = arith.constant 9.99999974E-6 : f32
    %436 = vector.broadcast %cst_108 : f32 to vector<2x1xf32>
    %437 = arith.addf %433, %436 : vector<2x1xf32>
    %438 = math.rsqrt %437 : vector<2x1xf32>
    %439 = vector.broadcast %438 : vector<2x1xf32> to vector<2x32xf32>
    %440 = arith.mulf %435, %439 : vector<2x32xf32>
    %441 = vector.broadcast %421 : vector<1x32xf32> to vector<2x32xf32>
    %442 = arith.mulf %440, %441 : vector<2x32xf32>
    %443 = vector.broadcast %422 : vector<1x32xf32> to vector<2x32xf32>
    %444 = arith.addf %442, %443 : vector<2x32xf32>
    %c0_109 = arith.constant 0 : index
    %c0_110 = arith.constant 0 : index
    %445 = vector.load %arg8[%c0_109, %c0_110] : memref<32x36xbf16, #tpu.memory_space<vmem>>, vector<32x36xbf16>
    %446 = arith.truncf %444 : vector<2x32xf32> to vector<2x32xbf16>
    %447 = vector.extract_strided_slice %445 {offsets = [0, 0], sizes = [32, 34], strides = [1, 1]} : vector<32x36xbf16> to vector<32x34xbf16>
    %cst_111 = arith.constant dense<0.000000e+00> : vector<2x34xf32>
    %448 = tpu.matmul %446, %447, %cst_111 {dimension_numbers = #tpu.dot_dimension_numbers<[1], [0], [0], [1], [0, 0, 1, 1], [], []>} : vector<2x32xbf16>, vector<32x34xbf16>, vector<2x34xf32> -> vector<2x34xf32>
    %449 = vector.extract_strided_slice %417 {offsets = [2, 0], sizes = [1, 34], strides = [1, 1]} : vector<8x128xf32> to vector<1x34xf32>
    %450 = vector.broadcast %449 : vector<1x34xf32> to vector<2x34xf32>
    %451 = arith.addf %448, %450 : vector<2x34xf32>
    %452 = vector.extract_strided_slice %451 {offsets = [0, 0], sizes = [2, 2], strides = [1, 1]} : vector<2x34xf32> to vector<2x2xf32>
    %453 = vector.extract_strided_slice %451 {offsets = [0, 2], sizes = [2, 32], strides = [1, 1]} : vector<2x34xf32> to vector<2x32xf32>
    %cst_112 = arith.constant 0.000000e+00 : f32
    %454 = vector.broadcast %cst_112 : f32 to vector<2x32xf32>
    %455 = arith.maximumf %453, %454 : vector<2x32xf32>
    %456 = arith.truncf %455 : vector<2x32xf32> to vector<2x32xbf16>
    %457 = vector.extract_strided_slice %445 {offsets = [0, 34], sizes = [32, 2], strides = [1, 1]} : vector<32x36xbf16> to vector<32x2xbf16>
    %cst_113 = arith.constant dense<0.000000e+00> : vector<2x2xf32>
    %458 = tpu.matmul %456, %457, %cst_113 {dimension_numbers = #tpu.dot_dimension_numbers<[1], [0], [0], [1], [0, 0, 1, 1], [], []>} : vector<2x32xbf16>, vector<32x2xbf16>, vector<2x2xf32> -> vector<2x2xf32>
    %459 = vector.extract_strided_slice %417 {offsets = [3, 0], sizes = [1, 2], strides = [1, 1]} : vector<8x128xf32> to vector<1x2xf32>
    %460 = vector.broadcast %459 : vector<1x2xf32> to vector<2x2xf32>
    %461 = arith.addf %458, %460 : vector<2x2xf32>
    %462 = arith.addf %452, %461 : vector<2x2xf32>
    %c0_114 = arith.constant 0 : index
    %c0_115 = arith.constant 0 : index
    %463 = vector.load %arg10[%c0_114, %c0_115] : memref<2x2xf32, #tpu.memory_space<vmem>>, vector<2x2xf32>
    tpu.vector_store %arg10[%c0_114, %c0_115], %462 {strides = array<i32>} : memref<2x2xf32, #tpu.memory_space<vmem>>, vector<2x2xf32>,
    return
  }
}

</mosaic_0001>

<bundles_post_ra>
// kernel: forward.1
= control target key start
LH: loop header
LB: loop body
LE: loop exit
PB: predicated region body
PF: predicated region fallthrough
CT: control target
= control target key end

     0   :  { %v3535_v1 = vmov 0   ;;  %v3536_v2 = vmov 0.0   ;;  %vm3537_vm0 = vmmov 0   ;;  %s4282_s0 = inlined_call_operand.vmem [shape: s32[16,1], index: 0, kind: input, shape index: {}]   ;;  %s4283_s1 = inlined_call_operand.vmem [shape: f32[2,8], index: 1, kind: input, shape index: {}]   ;;  %s4284_s2 = inlined_call_operand.vmem [shape: bf16[64,32], index: 2, kind: input, shape index: {}]   ;;  %s4285_s3 = inlined_call_operand.vmem [shape: f32[16,32], index: 3, kind: input, shape index: {}]   ;;  %s4286_s4 = inlined_call_operand.vmem [shape: bf16[2,32,192], index: 4, kind: input, shape index: {}]   ;;  %s4287_s5 = inlined_call_operand.vmem [shape: bf16[2,32,128], index: 5, kind: input, shape index: {}]   ;;  %s4288_s6 = inlined_call_operand.vmem [shape: bf16[2,128,32], index: 6, kind: input, shape index: {}]   ;;  %s4289_s7 = inlined_call_operand.vmem [shape: f32[2,8,128], index: 7, kind: input, shape index: {}]   ;;  %s4290_s8 = inlined_call_operand.vmem [shape: bf16[32,36], index: 8, kind: input, shape index: {}]   ;;  %s4291_s9 = inlined_call_operand.vmem [shape: f32[8,128], index: 9, kind: input, shape index: {}]   ;;  %s4292_s10 = inlined_call_operand.hbm [shape: f32[2,2], index: 10, kind: output, shape index: {}]  }
   0x1   :  { %v37_v0 = vld [vmem:[%s4282_s0] sm:$0xff]  ;;  %3380 = vset.pattern.permute.xlu0 %v3535_v1  ;;  %3087 = vmatprep.subr.bf16.mxu0 %v3536_v2  ;;  %v38_v4 = vld [vmem:[%s4282_s0 + $0x8] sm:$0xff]  ;;  %v3383_v6 = vld [vmem:[%s4284_s2 + $0x10] sm:$0xff]  }
   0x2   :  { %v3381_v3 = vld [vmem:[%s4284_s2] sm:$0xff]   ;;  %42 = vperm.xlu0 %3380, %v37_v0   ;;  %276 = vmatprep.mubr.bf16.mxu1 %v3535_v1  ;;  %v3382_v5 = vld [vmem:[%s4284_s2 + $0x8] sm:$0xff]   ;;  %v3384_v7 = vld [vmem:[%s4284_s2 + $0x18] sm:$0xff]  }
   0x3   :  { %3088 = vmatpush3.bf16.msra.mxu0 %v3381_v3  ;;  %3095 = vmatprep.mubr.msk.bf16.mxu0 %vm3537_vm0, %v3536_v2 }
   0x4   :  { %3089 = vmatprep.subr.bf16.mxu0 %v3536_v2 }
   0x6   :  { %45 = vperm.xlu0 %3380, %v38_v4  }
   0x7   :  { %3090 = vmatpush3.bf16.msra.mxu0 %v3382_v5 }
   0x8   :  { %3091 = vmatprep.subr.bf16.mxu0 %v3536_v2 }
   0xb   :  { %3092 = vmatpush3.bf16.msra.mxu0 %v3383_v6 }
   0xc   :  { %3093 = vmatprep.subr.bf16.mxu0 %v3536_v2 }
   0xf   :  { %3094 = vmatpush3.bf16.msra.mxu0 %v3384_v7 }
  0x10   :  { %3117 = vmatprep.subr.bf16.mxu0 %v3536_v2 }
  0x11   :  { %15 = vsyncpa [#allocation3], 0  ;;  %v39_v8 = vlaneseq  ;;  %vm88_vm3 = vcmask 523264   ;;  %v62_v15 = vld [vmem:[%s4285_s3] sm:$0xff]  ;;  %v63_v17 = vld [vmem:[%s4285_s3 + $0x8] sm:$0xff]  ;;  %vm176_vm4 = vcmask 261120  }
  0x12   :  { %v3385_v35 = vld [vmem:[%s4286_s4 + $0x4] ss:$8 sps:$4 sm:$0xff]   ;;  %v3387_v36 = vld [vmem:[%s4286_s4] ss:$8 sps:$4 sm:$0xff]   ;;  %v3388_v37 = vld [vmem:[%s4286_s4 + $0x14] ss:$8 sps:$4 sm:$0xff]  }
  0x13   :  { %v3634_v9 = vand.u32 127, %v39_v8  ;;  %244 = vmatprep.subr.bf16.mxu1 %v3385_v35  ;;  %v3390_v38 = vld [vmem:[%s4286_s4 + $0x10] ss:$8 sps:$4 sm:$0xff]   ;;  %v3673_v45 = vshrl.u32 %v39_v8, 7  ;;  %v3681_v47 = vld [vmem:[%s4289_s7] sm:$0xff]  ;;  %vm423_vm5 = vcmask 1043456  }
  0x14   :  { %245 = vmatpush1.bf16.msra.mxu1 %v3387_v36  ;;  %s3538_s16 = smov 96   ;;  %vm298_vm6 = vcmask 64512   ;;  %s3542_s19 = smov 120   ;;  %vm2683_vm8 = vcmask 261127   ;;  %vm2687_vm9 = vcmask 253952   ;;  %vm2754_vm10 = vcmask 1041409  }
  0x15   :  { %246 = vmatprep.subr.bf16.mxu1 %v3388_v37  ;;  %v3676_v46 = vsub.s32 0, %v3673_v45  ;;  %v3686_v51 = vsub.s32 1, %v3673_v45  ;;  %v289_v60 = vsub.s32 6, %v3673_v45  ;;  %vm136_vm7 = vcmp.ge.s32.totalorder %v3673_v45, %v3634_v9  ;;  %s3543_s20 = smov 80   ;;  %s3544_s21 = smov 112  }
  0x16   :  { %s3545_s22 = smov 64   ;;  %s3546_s0 = smov 72   ;;  %vm2871_vm11 = vcmask 9216  }
  0x17   :  { %v207_v50 = vrot.slane %v3681_v47, %v3676_v46  ;;  %v213_v55 = vrot.slane %v3681_v47, %v3686_v51  ;;  %v290_v61 = vrot.slane %v3681_v47, %v289_v60  ;;  %s3547_s23 = smov 104   ;;  %s3548_s2 = smov 32  }
  0x18   :  { %247 = vmatpush1.bf16.msra.mxu1 %v3390_v38  ;;  %s3549_s14 = smov 94  }
  0x19   :  { %3099 = vmatprep.subr.bf16.mxu1 %v3536_v2 }
  0x81   :  { %v43_v10 = vpop.permute.xlu0 %42 }
  0x82   :  { %vm47_vm1 = vcmp.eq.s32.totalorder %v3634_v9, %v43_v10 }
  0x83   :  { %v2887_v12 = vsel %vm47_vm1, 1.0, %v3536_v2 }
  0x85   :  { %v46_v11 = vpop.permute.xlu0 %45 }
  0x86   :  { %vm48_vm2 = vcmp.eq.s32.totalorder %v3634_v9, %v46_v11 }
  0x87   :  { %v2888_v13 = vsel %vm48_vm2, 1.0, %v3536_v2 }
  0x88   :  { %v53_v14 = vpack.c.bf16 %v2888_v13, %v2887_v12 }
  0x8a   :  { %3096 = vmatmul.mubr.msk.bf16.vlgmr.msra.gmra.mrb[0].mxu0 %vm88_vm3, %v53_v14 }
  0x8b   :  { %3119 = vmatprep.mubr.msk.bf16.mxu0 %vm3537_vm0, %v3536_v2 }
 0x15d   :  { %v126_v16 = vpop.f32.mrb[0].mxu0 }
 0x15e   :  { %v3648_v18 = vadd.f32 %v126_v16, %v62_v15  ;;  %v3097_v19 = vpop.f32.mrb[1].mxu0 }
 0x15f   :  { %v129_v20 = vpop.f32.mrb[2].mxu0 }
 0x160   :  { %v3650_v21 = vadd.f32 %v129_v20, %v63_v17  ;;  %v3098_v22 = vpop.f32.mrb[3].mxu0  ;;  %v177_v23 = vsel %vm176_vm4, %v3648_v18, 0.0  ;;  %v3539_v17 = vmov 1966171168   ;;  %v133_v20 = vld [vmem:[%s4283_s1] sm:$0x3] }
 0x161   :  { %178 = vadd.xlane.f32.xlu1 %v177_v23  ;;  %v142_v19 = vunpack.c.l.s4 %v3539_v17  ;;  %v2894_v22 = vadd.f32 -1.0, %v133_v20  ;;  %s3541_s1 = smov 88  }
 0x162   :  { %v180_v24 = vsel %vm176_vm4, %v3650_v21, 0.0 }
 0x163   :  { %v143_v23 = vunpack.c.0.s8 %v142_v19 }
 0x165   :  { %181 = vadd.xlane.f32.xlu1 %v180_v24  ;;  %v139_v24 = vmul.f32 1e+09, %v2894_v22 }
 0x1ee   :  { %v179_v25 = vpop.xlane.xlu1 %178 }
 0x1ef   :  { %v184_v26 = vmul.f32 0.03125, %v179_v25  ;;  %v146_v25 = vsub.s32 %v143_v23, %v3673_v45 }
 0x1f1   :  { %v186_v27 = vsub.f32 %v3648_v18, %v184_v26  ;;  %v147_v26 = vrot.slane %v139_v24, %v146_v25 }
 0x1f2   :  { %v182_v28 = vpop.xlane.xlu1 %181 }
 0x1f3   :  { %v185_v29 = vmul.f32 0.03125, %v182_v28  ;;  %v188_v30 = vmul.f32 %v186_v27, %v186_v27  ;;  %v148_v28 = vcombine.high %v147_v26, %v147_v26 }
 0x1f5   :  { %v187_v31 = vsub.f32 %v3650_v21, %v185_v29  ;;  %v190_v32 = vsel %vm176_vm4, %v188_v30, 0.0  ;;  %v3540_v30 = vmov -1e+09  }
 0x1f6   :  { %191 = vadd.xlane.f32.xlu0 %v190_v32  ;;  %v162_v32 = vrot.slane %v148_v28, %v146_v25 }
 0x1f7   :  { %v189_v33 = vmul.f32 %v187_v31, %v187_v31 }
 0x1f8   :  { %v170_v35 = vrot.slane %v162_v32, %v3676_v46 }
 0x1f9   :  { %v193_v34 = vsel %vm176_vm4, %v189_v33, 0.0 }
 0x1fa   :  { %194 = vadd.xlane.f32.xlu1 %v193_v34 }
 0x283   :  { %v192_v39 = vpop.xlane.xlu0 %191 }
 0x284   :  { %v196_v40 = vmul.f32 0.03125, %v192_v39 }
 0x286   :  { %v198_v41 = vadd.f32 1e-05, %v196_v40 }
 0x287   :  { %v195_v42 = vpop.xlane.xlu1 %194 }
 0x288   :  { %3419 = vrsqrt.f32 %v198_v41  ;;  %v197_v43 = vmul.f32 0.03125, %v195_v42 }
 0x28a   :  { %v199_v44 = vadd.f32 1e-05, %v197_v43 }
 0x28c   :  { %3421 = vrsqrt.f32 %v199_v44 }
 0x292   :  { %v3420_v48 = vpop.eup %3419 }
 0x293   :  { %v202_v49 = vmul.f32 %v3420_v48, %v186_v27  ;;  %v155_v27 = vrot.slane %v147_v26, %v146_v25 }
 0x295   :  { %v208_v54 = vmul.f32 %v207_v50, %v202_v49  ;;  %v166_v29 = vrot.slane %v155_v27, %v3676_v46 }
 0x296   :  { %v3422_v52 = vpop.eup %3421 }
 0x297   :  { %v203_v53 = vmul.f32 %v3422_v52, %v187_v31  ;;  %v214_v57 = vadd.f32 %v213_v55, %v208_v54  ;;  %v137_v31 = vsel %vm136_vm7, 0.0, %v3540_v30 }
 0x298   :  { %v3734_v33 = vadd.f32 %v166_v29, %v137_v31  ;;  %v3739_v9 = vadd.f32 %v170_v35, %v137_v31 }
 0x299   :  { %v209_v56 = vmul.f32 %v207_v50, %v203_v53 }
 0x29b   :  { %v215_v58 = vadd.f32 %v213_v55, %v209_v56 }
 0x29d   :  { %v216_v59 = vpack.c.bf16 %v215_v58, %v214_v57 }
 0x29f   :  { %2899 = vmatmul.mubr.msk.bf16.vlgmr.msra.gmra.mrb[0].mxu1 %vm176_vm4, %v216_v59 }
 0x2a0   :  { %3101 = vmatprep.mubr.msk.bf16.mxu1 %vm3537_vm0, %v3536_v2 }
 0x372   :  { %v278_v62 = vpop.f32.mrb[0].mxu1 }
 0x373   :  { %v280_v63 = vpop.f32.mrb[1].mxu1  ;;  %v3718_v15 = vpack.c.bf16 %v278_v62, %v278_v62 }
 0x374   :  { %v291_v0 = vadd.f32 %v290_v61, %v280_v63  ;;  %v282_v3 = vpop.f32.mrb[2].mxu1 }
 0x375   :  { %v3697_v4 = vpack.c.bf16 %v282_v3, %v282_v3  ;;  %v284_v5 = vpop.f32.mrb[3].mxu1  ;;  %v425_v16 = vsel %vm423_vm5, %v3718_v15, 0 }
 0x376   :  { %v3699_v6 = vpack.c.bf16 %v291_v0, %v291_v0  ;;  %v292_v7 = vadd.f32 %v290_v61, %v284_v5 }
 0x377   :  { %v471_v8 = vsel %vm423_vm5, %v3697_v4, 0 }
 0x378   :  { %296 = vrot.lane.b32.xlu1 %v3699_v6, %s3538_s16  ;;  %3118 = vmatpush3.bf16.msra.mxu0 %v471_v8  ;;  %v3706_v10 = vpack.c.bf16 %v292_v7, %v292_v7 }
 0x379   :  { %3129 = vmatprep.subr.bf16.mxu0 %v3536_v2 }
 0x37c   :  { %346 = vrot.lane.b32.xlu1 %v3706_v10, %s3538_s16 }
 0x3ea   :  { %v297_v11 = vpop.permute.xlu1 %296 }
 0x3eb   :  { %v303_v12 = vsel %vm298_vm6, %v297_v11, 0 }
 0x3ec   :  { %3100 = vmatpush3.bf16.xpose.msra.mxu1 %v303_v12 }
 0x3ed   :  { %3105 = vmatprep.subr.bf16.mxu1 %v3536_v2 }
 0x3ee   :  { %v347_v13 = vpop.permute.xlu1 %346 }
 0x3ef   :  { %v352_v14 = vsel %vm298_vm6, %v347_v13, 0 }
 0x3f3   :  { %3102 = vmatmul.mubr.msk.bf16.vlgmr.msra.gmra.mrb[4].mxu1 %vm298_vm6, %v3699_v6 }
 0x3f4   :  { %3106 = vmatpush3.bf16.xpose.msra.mxu1 %v352_v14  ;;  %3107 = vmatprep.mubr.msk.bf16.mxu1 %vm3537_vm0, %v3536_v2 }
 0x3f5   :  { %3111 = vmatprep.subr.bf16.mxu1 %v3536_v2 }
 0x3fb   :  { %3108 = vmatmul.mubr.msk.bf16.vlgmr.msra.gmra.mrb[8].mxu1 %vm298_vm6, %v3706_v10 }
 0x3fc   :  { %3112 = vmatpush3.bf16.msra.mxu1 %v425_v16  ;;  %3113 = vmatprep.mubr.msk.bf16.mxu1 %vm3537_vm0, %v3536_v2 }
 0x3fd   :  { %3123 = vmatprep.subr.bf16.mxu1 %v3536_v2 }
 0x4c6   :  { %v339_v34 = vpop.f32.mrb[4].mxu1 }
 0x4c7   :  { %v340_v36 = vadd.f32 %v339_v34, %v3734_v33  ;;  %v3103_v37 = vpop.f32.mrb[5].mxu1 }
 0x4c8   :  { %v342_v38 = vpop.f32.mrb[6].mxu1 }
 0x4c9   :  { %v3104_v39 = vpop.f32.mrb[7].mxu1  ;;  %v394_v40 = vsel %vm298_vm6, %v340_v36, -inf }
 0x4ca   :  { %395 = vmax.xlane.f32.xlu1 %v394_v40 }
 0x4ce   :  { %v388_v41 = vpop.f32.mrb[8].mxu1 }
 0x4cf   :  { %v389_v42 = vadd.f32 %v388_v41, %v3739_v9  ;;  %v3109_v43 = vpop.f32.mrb[9].mxu1 }
 0x4d0   :  { %v391_v44 = vpop.f32.mrb[10].mxu1 }
 0x4d1   :  { %v3110_v48 = vpop.f32.mrb[11].mxu1  ;;  %v397_v49 = vsel %vm298_vm6, %v389_v42, -inf }
 0x4d2   :  { %398 = vmax.xlane.f32.xlu0 %v397_v49 }
 0x4db   :  { %567 = vrot.lane.b32.xlu1 %v3706_v10, %s3541_s1 }
 0x557   :  { %v396_v50 = vpop.xlane.xlu1 %395 }
 0x558   :  { %v400_v52 = vsub.f32 %v340_v36, %v396_v50 }
 0x55a   :  { %v402_v53 = vmul.f32 1.442695, %v400_v52 }
 0x55b   :  { %v568_v13 = vpop.permute.xlu1 %567 }
 0x55c   :  { %3423 = vpow2.f32 %v402_v53  ;;  %v573_v17 = vsel %vm298_vm6, %v568_v13, 0 }
 0x55f   :  { %v399_v54 = vpop.xlane.xlu0 %398 }
 0x560   :  { %v401_v55 = vsub.f32 %v389_v42, %v399_v54 }
 0x562   :  { %v404_v56 = vmul.f32 1.442695, %v401_v55 }
 0x564   :  { %3425 = vpow2.f32 %v404_v56 }
 0x566   :  { %v3424_v57 = vpop.eup %3423 }
 0x567   :  { %v406_v58 = vsel %vm298_vm6, %v3424_v57, 0.0 }
 0x568   :  { %407 = vadd.xlane.f32.xlu0 %v406_v58 }
 0x56e   :  { %v3426_v59 = vpop.eup %3425 }
 0x56f   :  { %v409_v61 = vsel %vm298_vm6, %v3426_v59, 0.0 }
 0x570   :  { %410 = vadd.xlane.f32.xlu0 %v409_v61 }
 0x586   :  { %517 = vrot.lane.b32.xlu0 %v3699_v6, %s3541_s1 }
 0x58a   :  { %515 = vrot.lane.b32.xlu0 %v3699_v6, %s3542_s19 }
 0x58e   :  { %565 = vrot.lane.b32.xlu0 %v3706_v10, %s3542_s19 }
 0x5f5   :  { %v408_v62 = vpop.xlane.xlu0 %407 }
 0x5f6   :  { %3427 = vrcp.f32 %v408_v62 }
 0x5fd   :  { %v411_v63 = vpop.xlane.xlu0 %410 }
 0x5fe   :  { %3429 = vrcp.f32 %v411_v63 }
 0x600   :  { %v3428_v0 = vpop.eup %3427 }
 0x601   :  { %v414_v3 = vmul.f32 %v3428_v0, %v3424_v57  ;;  %v518_v5 = vpop.permute.xlu0 %517 }
 0x602   :  { %v523_v8 = vsel %vm298_vm6, %v518_v5, 0 }
 0x603   :  { %v416_v7 = vpack.c.bf16 %v414_v3, %v414_v3 }
 0x605   :  { %3114 = vmatmul.mubr.msk.bf16.vlgmr.msra.gmra.mrb[12].mxu1 %vm298_vm6, %v416_v7  ;;  %v516_v16 = vpop.permute.xlu0 %515 }
 0x606   :  { %3124 = vmatpush3.bf16.xpose.msra.mxu1 %v523_v8  ;;  %3125 = vmatprep.mubr.msk.bf16.mxu1 %vm3537_vm0, %v3536_v2 }
 0x607   :  { %3135 = vmatprep.subr.bf16.mxu1 %v3536_v2 }
 0x608   :  { %v3430_v11 = vpop.eup %3429 }
 0x609   :  { %v415_v12 = vmul.f32 %v3430_v11, %v3426_v59  ;;  %v566_v19 = vpop.permute.xlu0 %565 }
 0x60b   :  { %v417_v14 = vpack.c.bf16 %v415_v12, %v415_v12 }
 0x60d   :  { %3120 = vmatmul.mubr.msk.bf16.vlgmr.msra.gmra.mrb[4].mxu0 %vm298_vm6, %v417_v14  ;;  %3126 = vmatmul.mubr.msk.bf16.vlgmr.msra.gmra.mrb[16].mxu1 %vm298_vm6, %v516_v16 }
 0x60e   :  { %3130 = vmatpush3.bf16.xpose.msra.mxu0 %v573_v17  ;;  %3131 = vmatprep.mubr.msk.bf16.mxu0 %vm3537_vm0, %v3536_v2 }
 0x60f   :  { %3141 = vmatprep.subr.bf16.mxu0 %v3536_v2  ;;  %3137 = vmatprep.mubr.msk.bf16.mxu1 %vm3537_vm0, %v3536_v2 }
 0x615   :  { %3132 = vmatmul.mubr.msk.bf16.vlgmr.msra.gmra.mrb[8].mxu0 %vm298_vm6, %v566_v19 }
 0x616   :  { %3143 = vmatprep.mubr.msk.bf16.mxu0 %vm3537_vm0, %v3536_v2 }
 0x6d8   :  { %v3769_v20 = vpop.f32.mrb[12].mxu1 }
 0x6d9   :  { %v3115_v22 = vpop.f32.mrb[13].mxu1 }
 0x6da   :  { %v464_v23 = vpop.f32.mrb[14].mxu1 }
 0x6db   :  { %v3116_v24 = vpop.f32.mrb[15].mxu1 }
 0x6e0   :  { %v3771_v25 = vpop.f32.mrb[4].mxu0  ;;  %v559_v26 = vpop.f32.mrb[16].mxu1 }
 0x6e1   :  { %v560_v27 = vadd.f32 %v559_v26, %v3734_v33  ;;  %v3121_v28 = vpop.f32.mrb[5].mxu0  ;;  %v3127_v29 = vpop.f32.mrb[17].mxu1 }
 0x6e2   :  { %v510_v30 = vpop.f32.mrb[6].mxu0  ;;  %v562_v31 = vpop.f32.mrb[18].mxu1 }
 0x6e3   :  { %v3122_v32 = vpop.f32.mrb[7].mxu0  ;;  %v3128_v34 = vpop.f32.mrb[19].mxu1  ;;  %v615_v35 = vsel %vm298_vm6, %v560_v27, -inf }
 0x6e4   :  { %616 = vmax.xlane.f32.xlu0 %v615_v35 }
 0x6e8   :  { %v609_v36 = vpop.f32.mrb[8].mxu0 }
 0x6e9   :  { %v610_v37 = vadd.f32 %v609_v36, %v3739_v9  ;;  %v3133_v38 = vpop.f32.mrb[9].mxu0 }
 0x6ea   :  { %v612_v39 = vpop.f32.mrb[10].mxu0 }
 0x6eb   :  { %v3134_v40 = vpop.f32.mrb[11].mxu0  ;;  %v618_v41 = vsel %vm298_vm6, %v610_v37, -inf }
 0x6ec   :  { %619 = vmax.xlane.f32.xlu1 %v618_v41 }
 0x6fa   :  { %640 = vrot.lane.b32.xlu0 %v3718_v15, %s3538_s16 }
 0x6fd   :  { %689 = vrot.lane.b32.xlu1 %v3697_v4, %s3538_s16 }
 0x701   :  { %741 = vrot.lane.b32.xlu1 %v3699_v6, %s3543_s20 }
 0x705   :  { %739 = vrot.lane.b32.xlu1 %v3699_v6, %s3544_s21 }
 0x771   :  { %v617_v42 = vpop.xlane.xlu0 %616 }
 0x772   :  { %v621_v43 = vsub.f32 %v560_v27, %v617_v42 }
 0x774   :  { %v623_v44 = vmul.f32 1.442695, %v621_v43 }
 0x775   :  { %v641_v48 = vpop.permute.xlu0 %640 }
 0x776   :  { %3431 = vpow2.f32 %v623_v44  ;;  %v646_v49 = vsel %vm423_vm5, %v641_v48, 0 }
 0x777   :  { %3136 = vmatpush3.bf16.msra.mxu1 %v646_v49 }
 0x778   :  { %3147 = vmatprep.subr.bf16.mxu1 %v3536_v2 }
 0x779   :  { %v620_v50 = vpop.xlane.xlu1 %619 }
 0x77a   :  { %v622_v52 = vsub.f32 %v610_v37, %v620_v50 }
 0x77c   :  { %v625_v53 = vmul.f32 1.442695, %v622_v52 }
 0x77d   :  { %v690_v54 = vpop.permute.xlu1 %689 }
 0x77e   :  { %3433 = vpow2.f32 %v625_v53  ;;  %v695_v55 = vsel %vm423_vm5, %v690_v54, 0 }
 0x77f   :  { %3142 = vmatpush3.bf16.msra.mxu0 %v695_v55 }
 0x780   :  { %v3432_v56 = vpop.eup %3431  ;;  %3153 = vmatprep.subr.bf16.mxu0 %v3536_v2 }
 0x781   :  { %v627_v57 = vsel %vm298_vm6, %v3432_v56, 0.0  ;;  %v742_v3 = vpop.permute.xlu1 %741 }
 0x782   :  { %628 = vadd.xlane.f32.xlu0 %v627_v57  ;;  %v747_v7 = vsel %vm298_vm6, %v742_v3, 0 }
 0x785   :  { %v740_v14 = vpop.permute.xlu1 %739 }
 0x788   :  { %v3434_v58 = vpop.eup %3433 }
 0x789   :  { %v630_v59 = vsel %vm298_vm6, %v3434_v58, 0.0 }
 0x78a   :  { %631 = vadd.xlane.f32.xlu0 %v630_v59 }
 0x7a0   :  { %791 = vrot.lane.b32.xlu0 %v3706_v10, %s3543_s20 }
 0x7a4   :  { %789 = vrot.lane.b32.xlu0 %v3706_v10, %s3544_s21 }
 0x80f   :  { %v629_v61 = vpop.xlane.xlu0 %628 }
 0x810   :  { %3435 = vrcp.f32 %v629_v61 }
 0x817   :  { %v632_v62 = vpop.xlane.xlu0 %631 }
 0x818   :  { %3437 = vrcp.f32 %v632_v62 }
 0x81a   :  { %v3436_v63 = vpop.eup %3435 }
 0x81b   :  { %v635_v0 = vmul.f32 %v3436_v63, %v3432_v56  ;;  %v792_v12 = vpop.permute.xlu0 %791 }
 0x81c   :  { %v797_v16 = vsel %vm298_vm6, %v792_v12, 0 }
 0x81d   :  { %v637_v5 = vpack.c.bf16 %v635_v0, %v635_v0 }
 0x81f   :  { %3138 = vmatmul.mubr.msk.bf16.vlgmr.msra.gmra.mrb[20].mxu1 %vm298_vm6, %v637_v5  ;;  %v790_v17 = vpop.permute.xlu0 %789 }
 0x820   :  { %3148 = vmatpush3.bf16.xpose.msra.mxu1 %v747_v7  ;;  %3149 = vmatprep.mubr.msk.bf16.mxu1 %vm3537_vm0, %v3536_v2 }
 0x821   :  { %3159 = vmatprep.subr.bf16.mxu1 %v3536_v2 }
 0x822   :  { %v3438_v8 = vpop.eup %3437 }
 0x823   :  { %v636_v11 = vmul.f32 %v3438_v8, %v3434_v58 }
 0x825   :  { %v638_v13 = vpack.c.bf16 %v636_v11, %v636_v11 }
 0x827   :  { %3144 = vmatmul.mubr.msk.bf16.vlgmr.msra.gmra.mrb[12].mxu0 %vm298_vm6, %v638_v13  ;;  %3150 = vmatmul.mubr.msk.bf16.vlgmr.msra.gmra.mrb[24].mxu1 %vm298_vm6, %v740_v14 }
 0x828   :  { %3154 = vmatpush3.bf16.xpose.msra.mxu0 %v797_v16  ;;  %3155 = vmatprep.mubr.msk.bf16.mxu0 %vm3537_vm0, %v3536_v2 }
 0x829   :  { %3165 = vmatprep.subr.bf16.mxu0 %v3536_v2  ;;  %3161 = vmatprep.mubr.msk.bf16.mxu1 %vm3537_vm0, %v3536_v2 }
 0x82f   :  { %3156 = vmatmul.mubr.msk.bf16.vlgmr.msra.gmra.mrb[16].mxu0 %vm298_vm6, %v790_v17 }
 0x830   :  { %3167 = vmatprep.mubr.msk.bf16.mxu0 %vm3537_vm0, %v3536_v2 }
 0x8f2   :  { %v682_v19 = vpop.f32.mrb[20].mxu1 }
 0x8f3   :  { %v3812_v22 = vadd.f32 %v682_v19, %v3769_v20  ;;  %v3139_v23 = vpop.f32.mrb[21].mxu1 }
 0x8f4   :  { %v685_v24 = vpop.f32.mrb[22].mxu1 }
 0x8f5   :  { %v3140_v26 = vpop.f32.mrb[23].mxu1 }
 0x8fa   :  { %v731_v27 = vpop.f32.mrb[12].mxu0  ;;  %v783_v28 = vpop.f32.mrb[24].mxu1 }
 0x8fb   :  { %v3815_v29 = vadd.f32 %v731_v27, %v3771_v25  ;;  %v784_v30 = vadd.f32 %v783_v28, %v3734_v33  ;;  %v3145_v31 = vpop.f32.mrb[13].mxu0  ;;  %v3151_v32 = vpop.f32.mrb[25].mxu1 }
 0x8fc   :  { %v734_v34 = vpop.f32.mrb[14].mxu0  ;;  %v786_v35 = vpop.f32.mrb[26].mxu1 }
 0x8fd   :  { %v3146_v36 = vpop.f32.mrb[15].mxu0  ;;  %v3152_v37 = vpop.f32.mrb[27].mxu1  ;;  %v839_v38 = vsel %vm298_vm6, %v784_v30, -inf }
 0x8fe   :  { %840 = vmax.xlane.f32.xlu1 %v839_v38 }
 0x902   :  { %v833_v20 = vpop.f32.mrb[16].mxu0 }
 0x903   :  { %v834_v39 = vadd.f32 %v833_v20, %v3739_v9  ;;  %v3157_v40 = vpop.f32.mrb[17].mxu0 }
 0x904   :  { %v836_v41 = vpop.f32.mrb[18].mxu0 }
 0x905   :  { %v3158_v42 = vpop.f32.mrb[19].mxu0  ;;  %v842_v25 = vsel %vm298_vm6, %v834_v39, -inf }
 0x906   :  { %843 = vmax.xlane.f32.xlu0 %v842_v25 }
 0x90f   :  { %911 = vrot.lane.b32.xlu1 %v3697_v4, %s3545_s22 }
 0x91c   :  { %863 = vrot.lane.b32.xlu0 %v3718_v15, %s3545_s22 }
 0x98b   :  { %v841_v43 = vpop.xlane.xlu1 %840 }
 0x98c   :  { %v845_v44 = vsub.f32 %v784_v30, %v841_v43 }
 0x98e   :  { %v847_v48 = vmul.f32 1.442695, %v845_v44 }
 0x98f   :  { %v912_v49 = vpop.permute.xlu1 %911 }
 0x990   :  { %3439 = vpow2.f32 %v847_v48  ;;  %v917_v50 = vsel %vm423_vm5, %v912_v49, 0 }
 0x991   :  { %3166 = vmatpush3.bf16.msra.mxu0 %v917_v50 }
 0x992   :  { %3177 = vmatprep.subr.bf16.mxu0 %v3536_v2 }
 0x993   :  { %v844_v52 = vpop.xlane.xlu0 %843 }
 0x994   :  { %v846_v53 = vsub.f32 %v834_v39, %v844_v52 }
 0x996   :  { %v849_v54 = vmul.f32 1.442695, %v846_v53 }
 0x997   :  { %v864_v55 = vpop.permute.xlu0 %863 }
 0x998   :  { %3441 = vpow2.f32 %v849_v54  ;;  %v869_v56 = vsel %vm423_vm5, %v864_v55, 0 }
 0x999   :  { %3160 = vmatpush3.bf16.msra.mxu1 %v869_v56 }
 0x99a   :  { %v3440_v57 = vpop.eup %3439  ;;  %3171 = vmatprep.subr.bf16.mxu1 %v3536_v2 }
 0x99b   :  { %v851_v58 = vsel %vm298_vm6, %v3440_v57, 0.0 }
 0x99c   :  { %852 = vadd.xlane.f32.xlu0 %v851_v58 }
 0x9a2   :  { %v3442_v59 = vpop.eup %3441 }
 0x9a3   :  { %v854_v61 = vsel %vm298_vm6, %v3442_v59, 0.0 }
 0x9a4   :  { %855 = vadd.xlane.f32.xlu1 %v854_v61 }
 0x9b2   :  { %1013 = vrot.lane.b32.xlu0 %v3706_v10, %s3546_s0 }
 0x9b5   :  { %963 = vrot.lane.b32.xlu1 %v3699_v6, %s3546_s0 }
 0x9b6   :  { %1011 = vrot.lane.b32.xlu0 %v3706_v10, %s3547_s23 }
 0x9b9   :  { %961 = vrot.lane.b32.xlu1 %v3699_v6, %s3547_s23 }
 0xa29   :  { %v853_v62 = vpop.xlane.xlu0 %852 }
 0xa2a   :  { %3443 = vrcp.f32 %v853_v62 }
 0xa2d   :  { %v1014_v11 = vpop.permute.xlu0 %1013 }
 0xa2e   :  { %v1019_v14 = vsel %vm298_vm6, %v1014_v11, 0 }
 0xa31   :  { %v856_v63 = vpop.xlane.xlu1 %855  ;;  %v1012_v16 = vpop.permute.xlu0 %1011 }
 0xa32   :  { %3445 = vrcp.f32 %v856_v63 }
 0xa34   :  { %v3444_v0 = vpop.eup %3443 }
 0xa35   :  { %v859_v3 = vmul.f32 %v3444_v0, %v3440_v57  ;;  %v964_v5 = vpop.permute.xlu1 %963 }
 0xa36   :  { %v969_v8 = vsel %vm298_vm6, %v964_v5, 0 }
 0xa37   :  { %v861_v7 = vpack.c.bf16 %v859_v3, %v859_v3 }
 0xa39   :  { %3162 = vmatmul.mubr.msk.bf16.vlgmr.msra.gmra.mrb[28].mxu1 %vm298_vm6, %v861_v7  ;;  %v962_v13 = vpop.permute.xlu1 %961  ;;  %v1187_v7 = vsub.s32 5, %v3673_v45 }
 0xa3a   :  { %3172 = vmatpush3.bf16.xpose.msra.mxu1 %v969_v8  ;;  %3173 = vmatprep.mubr.msk.bf16.mxu1 %vm3537_vm0, %v3536_v2 }
 0xa3b   :  { %3183 = vmatprep.subr.bf16.mxu1 %v3536_v2 }
 0xa3c   :  { %v3446_v10 = vpop.eup %3445 }
 0xa3d   :  { %v860_v6 = vmul.f32 %v3446_v10, %v3442_v59 }
 0xa3f   :  { %v862_v12 = vpack.c.bf16 %v860_v6, %v860_v6  ;;  %v1188_v6 = vrot.slane %v3681_v47, %v1187_v7 }
 0xa41   :  { %3168 = vmatmul.mubr.msk.bf16.vlgmr.msra.gmra.mrb[20].mxu0 %vm298_vm6, %v862_v12  ;;  %3174 = vmatmul.mubr.msk.bf16.vlgmr.msra.gmra.mrb[32].mxu1 %vm298_vm6, %v962_v13 }
 0xa42   :  { %3178 = vmatpush3.bf16.xpose.msra.mxu0 %v1019_v14  ;;  %3179 = vmatprep.mubr.msk.bf16.mxu0 %vm3537_vm0, %v3536_v2 }
 0xa43   :  { %3189 = vmatprep.subr.bf16.mxu0 %v3536_v2  ;;  %3185 = vmatprep.mubr.msk.bf16.mxu1 %vm3537_vm0, %v3536_v2 }
 0xa49   :  { %3180 = vmatmul.mubr.msk.bf16.vlgmr.msra.gmra.mrb[24].mxu0 %vm298_vm6, %v1012_v16 }
 0xa4a   :  { %3191 = vmatprep.mubr.msk.bf16.mxu0 %vm3537_vm0, %v3536_v2 }
 0xb0c   :  { %v905_v17 = vpop.f32.mrb[28].mxu1 }
 0xb0d   :  { %v3856_v19 = vadd.f32 %v905_v17, %v3812_v22  ;;  %v3163_v23 = vpop.f32.mrb[29].mxu1 }
 0xb0e   :  { %v908_v24 = vpop.f32.mrb[30].mxu1 }
 0xb0f   :  { %v3164_v26 = vpop.f32.mrb[31].mxu1 }
 0xb14   :  { %v953_v27 = vpop.f32.mrb[20].mxu0  ;;  %v1005_v28 = vpop.f32.mrb[32].mxu1 }
 0xb15   :  { %v3859_v30 = vadd.f32 %v953_v27, %v3815_v29  ;;  %v1006_v31 = vadd.f32 %v1005_v28, %v3734_v33  ;;  %v3169_v32 = vpop.f32.mrb[21].mxu0  ;;  %v3175_v34 = vpop.f32.mrb[33].mxu1 }
 0xb16   :  { %v956_v35 = vpop.f32.mrb[22].mxu0  ;;  %v1008_v36 = vpop.f32.mrb[34].mxu1 }
 0xb17   :  { %v3170_v37 = vpop.f32.mrb[23].mxu0  ;;  %v3176_v38 = vpop.f32.mrb[35].mxu1  ;;  %v1061_v20 = vsel %vm298_vm6, %v1006_v31, -inf }
 0xb18   :  { %1062 = vmax.xlane.f32.xlu1 %v1061_v20 }
 0xb1c   :  { %v1055_v22 = vpop.f32.mrb[24].mxu0 }
 0xb1d   :  { %v1056_v39 = vadd.f32 %v1055_v22, %v3739_v9  ;;  %v3181_v40 = vpop.f32.mrb[25].mxu0 }
 0xb1e   :  { %v1058_v41 = vpop.f32.mrb[26].mxu0  ;;  %v3392_v40 = vld [vmem:[%s4287_s5 + $0x8] sm:$0xff]  }
 0xb1f   :  { %v3182_v42 = vpop.f32.mrb[27].mxu0  ;;  %v1064_v29 = vsel %vm298_vm6, %v1056_v39, -inf }
 0xb20   :  { %1065 = vmax.xlane.f32.xlu0 %v1064_v29 }
 0xba5   :  { %v1063_v25 = vpop.xlane.xlu1 %1062 }
 0xba6   :  { %v1067_v43 = vsub.f32 %v1006_v31, %v1063_v25 }
 0xba8   :  { %v1069_v44 = vmul.f32 1.442695, %v1067_v43 }
 0xbaa   :  { %3447 = vpow2.f32 %v1069_v44 }
 0xbad   :  { %v1066_v48 = vpop.xlane.xlu0 %1065 }
 0xbae   :  { %v1068_v49 = vsub.f32 %v1056_v39, %v1066_v48  ;;  %v3391_v39 = vld [vmem:[%s4287_s5] sm:$0xff]   ;;  %v3909_v48 = vsub.s32 2, %v3673_v45 }
 0xbb0   :  { %v1071_v50 = vmul.f32 1.442695, %v1068_v49 }
 0xbb2   :  { %3449 = vpow2.f32 %v1071_v50  ;;  %v1220_v50 = vrot.slane %v3681_v47, %v3909_v48 }
 0xbb4   :  { %v3448_v52 = vpop.eup %3447 }
 0xbb5   :  { %v1073_v53 = vsel %vm298_vm6, %v3448_v52, 0.0 }
 0xbb6   :  { %1074 = vadd.xlane.f32.xlu0 %v1073_v53  ;;  %v3914_v53 = vsub.s32 3, %v3673_v45 }
 0xbbc   :  { %v3450_v54 = vpop.eup %3449 }
 0xbbd   :  { %v1076_v55 = vsel %vm298_vm6, %v3450_v54, 0.0 }
 0xbbe   :  { %1077 = vadd.xlane.f32.xlu1 %v1076_v55 }
 0xbcc   :  { %1085 = vrot.lane.b32.xlu0 %v3718_v15, %s3548_s2 }
 0xbcf   :  { %1133 = vrot.lane.b32.xlu1 %v3697_v4, %s3548_s2 }
 0xc43   :  { %v1075_v56 = vpop.xlane.xlu0 %1074 }
 0xc44   :  { %3451 = vrcp.f32 %v1075_v56 }
 0xc47   :  { %v1086_v57 = vpop.permute.xlu0 %1085 }
 0xc48   :  { %v1091_v58 = vsel %vm423_vm5, %v1086_v57, 0  ;;  %v1226_v57 = vrot.slane %v3681_v47, %v3914_v53 }
 0xc49   :  { %3184 = vmatpush3.bf16.msra.mxu1 %v1091_v58 }
 0xc4a   :  { %3195 = vmatprep.subr.bf16.mxu1 %v3536_v2 }
 0xc4b   :  { %v1078_v59 = vpop.xlane.xlu1 %1077 }
 0xc4c   :  { %3453 = vrcp.f32 %v1078_v59 }
 0xc4e   :  { %v3452_v61 = vpop.eup %3451 }
 0xc4f   :  { %v1081_v62 = vmul.f32 %v3452_v61, %v3448_v52  ;;  %v1134_v63 = vpop.permute.xlu1 %1133 }
 0xc50   :  { %v1139_v0 = vsel %vm423_vm5, %v1134_v63, 0  ;;  %v3393_v63 = vld [vmem:[%s4288_s6] sm:$0xff]  }
 0xc51   :  { %3190 = vmatpush3.bf16.msra.mxu0 %v1139_v0  ;;  %v1083_v15 = vpack.c.bf16 %v1081_v62, %v1081_v62  ;;  %v3394_v0 = vld [vmem:[%s4288_s6 + $0x8] sm:$0xff]  }
 0xc52   :  { %3203 = vmatprep.subr.bf16.mxu0 %v3536_v2 }
 0xc53   :  { %3186 = vmatmul.mubr.msk.bf16.vlgmr.msra.gmra.mrb[36].mxu1 %vm298_vm6, %v1083_v15  ;;  %v3395_v15 = vld [vmem:[%s4288_s6 + $0x10] sm:$0xff]  }
 0xc54   :  { %3199 = vmatprep.mubr.msk.bf16.mxu1 %vm3537_vm0, %v3536_v2  ;;  %3196 = vmatpush3.bf16.msra.mxu1 %v3391_v39 }
 0xc55   :  { %3197 = vmatprep.subr.bf16.mxu1 %v3536_v2 }
 0xc56   :  { %v3454_v4 = vpop.eup %3453 }
 0xc57   :  { %v1082_v3 = vmul.f32 %v3454_v4, %v3450_v54  ;;  %v3397_v4 = vld [vmem:[%s4288_s6 + $0x20] sm:$0xff]  }
 0xc58   :  { %3198 = vmatpush3.bf16.msra.mxu1 %v3392_v40 }
 0xc59   :  { %v1084_v5 = vpack.c.bf16 %v1082_v3, %v1082_v3  ;;  %v3398_v3 = vld [vmem:[%s4288_s6 + $0x28] sm:$0xff]  }
 0xc5b   :  { %3192 = vmatmul.mubr.msk.bf16.vlgmr.msra.gmra.mrb[28].mxu0 %vm298_vm6, %v1084_v5  ;;  %v3399_v5 = vld [vmem:[%s4288_s6 + $0x30] sm:$0xff]  }
 0xc5c   :  { %3219 = vmatprep.mubr.msk.bf16.mxu0 %vm3537_vm0, %v3536_v2  ;;  %3204 = vmatpush3.bf16.msra.mxu0 %v3393_v63 }
 0xc5d   :  { %3205 = vmatprep.subr.bf16.mxu0 %v3536_v2 }
 0xc60   :  { %3206 = vmatpush3.bf16.msra.mxu0 %v3394_v0 }
 0xc61   :  { %3207 = vmatprep.subr.bf16.mxu0 %v3536_v2 }
 0xc64   :  { %3208 = vmatpush3.bf16.msra.mxu0 %v3395_v15 }
 0xc65   :  { %3209 = vmatprep.subr.bf16.mxu0 %v3536_v2 }
 0xd26   :  { %v1127_v8 = vpop.f32.mrb[36].mxu1 }
 0xd27   :  { %v1181_v10 = vadd.f32 %v1127_v8, %v3856_v19  ;;  %v3187_v11 = vpop.f32.mrb[37].mxu1  ;;  %v3400_v8 = vld [vmem:[%s4288_s6 + $0x38] sm:$0xff]  }
 0xd28   :  { %v1130_v12 = vpop.f32.mrb[38].mxu1 }
 0xd29   :  { %v1183_v13 = vadd.f32 %v1181_v10, %v3648_v18  ;;  %v3188_v14 = vpop.f32.mrb[39].mxu1  ;;  %v1236_v10 = vsub.s32 4, %v3673_v45 }
 0xd2b   :  { %v3887_v16 = vadd.f32 %v1188_v6, %v1183_v13 }
 0xd2d   :  { %v1191_v17 = vsel %vm176_vm4, %v3887_v16, 0.0 }
 0xd2e   :  { %1192 = vadd.xlane.f32.xlu1 %v1191_v17  ;;  %v1175_v23 = vpop.f32.mrb[28].mxu0 }
 0xd2f   :  { %v1182_v24 = vadd.f32 %v1175_v23, %v3859_v30  ;;  %v3193_v26 = vpop.f32.mrb[29].mxu0 }
 0xd30   :  { %v1178_v19 = vpop.f32.mrb[30].mxu0 }
 0xd31   :  { %v1184_v27 = vadd.f32 %v1182_v24, %v3650_v21  ;;  %v3194_v28 = vpop.f32.mrb[31].mxu0 }
 0xd33   :  { %v3893_v31 = vadd.f32 %v1188_v6, %v1184_v27  ;;  %v1237_v6 = vrot.slane %v3681_v47, %v1236_v10 }
 0xd35   :  { %v1194_v18 = vsel %vm176_vm4, %v3893_v31, 0.0 }
 0xd36   :  { %1195 = vadd.xlane.f32.xlu0 %v1194_v18 }
 0xdbb   :  { %v1193_v32 = vpop.xlane.xlu1 %1192 }
 0xdbc   :  { %v1197_v34 = vmul.f32 0.03125, %v1193_v32 }
 0xdbe   :  { %v1199_v35 = vsub.f32 %v3887_v16, %v1197_v34 }
 0xdc0   :  { %v1201_v36 = vmul.f32 %v1199_v35, %v1199_v35 }
 0xdc2   :  { %v1203_v37 = vsel %vm176_vm4, %v1201_v36, 0.0 }
 0xdc3   :  { %1204 = vadd.xlane.f32.xlu0 %v1203_v37  ;;  %v1196_v30 = vpop.xlane.xlu0 %1195 }
 0xdc4   :  { %v1198_v38 = vmul.f32 0.03125, %v1196_v30 }
 0xdc6   :  { %v1200_v20 = vsub.f32 %v3893_v31, %v1198_v38 }
 0xdc8   :  { %v1202_v21 = vmul.f32 %v1200_v20, %v1200_v20 }
 0xdca   :  { %v1206_v22 = vsel %vm176_vm4, %v1202_v21, 0.0 }
 0xdcb   :  { %1207 = vadd.xlane.f32.xlu1 %v1206_v22 }
 0xe50   :  { %v1205_v41 = vpop.xlane.xlu0 %1204 }
 0xe51   :  { %v1209_v42 = vmul.f32 0.03125, %v1205_v41 }
 0xe53   :  { %v1211_v29 = vadd.f32 1e-05, %v1209_v42  ;;  %v1422_v42 = vsub.s32 7, %v3673_v45 }
 0xe55   :  { %3455 = vrsqrt.f32 %v1211_v29  ;;  %v1423_v29 = vrot.slane %v3681_v47, %v1422_v42 }
 0xe58   :  { %v1208_v25 = vpop.xlane.xlu1 %1207 }
 0xe59   :  { %v1210_v43 = vmul.f32 0.03125, %v1208_v25 }
 0xe5b   :  { %v1212_v44 = vadd.f32 1e-05, %v1210_v43 }
 0xe5d   :  { %3457 = vrsqrt.f32 %v1212_v44 }
 0xe5f   :  { %v3456_v49 = vpop.eup %3455 }
 0xe60   :  { %v1215_v52 = vmul.f32 %v3456_v49, %v1199_v35 }
 0xe62   :  { %v1221_v55 = vmul.f32 %v1220_v50, %v1215_v52 }
 0xe64   :  { %v1227_v59 = vadd.f32 %v1226_v57, %v1221_v55 }
 0xe67   :  { %v3458_v54 = vpop.eup %3457 }
 0xe68   :  { %v1216_v56 = vmul.f32 %v3458_v54, %v1200_v20 }
 0xe6a   :  { %v1222_v58 = vmul.f32 %v1220_v50, %v1216_v56 }
 0xe6c   :  { %v1228_v61 = vadd.f32 %v1226_v57, %v1222_v58 }
 0xe6e   :  { %v1229_v62 = vpack.c.bf16 %v1228_v61, %v1227_v59 }
 0xe70   :  { %3200 = vmatmul.mubr.msk.bf16.vlgmr.msra.gmra.mrb[40].mxu1 %vm176_vm4, %v1229_v62 }
 0xe71   :  { %1527 = vmatprep.mubr.bf16.mxu1 %v3535_v1  ;;  %v3396_v1 = vld [vmem:[%s4288_s6 + $0x18] sm:$0xff]  }
 0xe72   :  { %3210 = vmatpush3.bf16.msra.mxu0 %v3396_v1  ;;  %v3403_v1 = vld [vmem:[%s4286_s4 + $0x24] ss:$8 sps:$4 sm:$0xff]  }
 0xe73   :  { %3211 = vmatprep.subr.bf16.mxu0 %v3536_v2  ;;  %1495 = vmatprep.subr.bf16.mxu1 %v3403_v1 }
 0xe76   :  { %3212 = vmatpush3.bf16.msra.mxu0 %v3397_v4  ;;  %v3401_v4 = vld [vmem:[%s4286_s4 + $0x20] ss:$8 sps:$4 sm:$0xff]  }
 0xe77   :  { %3213 = vmatprep.subr.bf16.mxu0 %v3536_v2  ;;  %1496 = vmatpush1.bf16.msra.mxu1 %v3401_v4 }
 0xe7a   :  { %3214 = vmatpush3.bf16.msra.mxu0 %v3398_v3  ;;  %v3404_v3 = vld [vmem:[%s4286_s4 + $0x30] ss:$8 sps:$4 sm:$0xff]  }
 0xe7b   :  { %3215 = vmatprep.subr.bf16.mxu0 %v3536_v2 }
 0xe7e   :  { %3216 = vmatpush3.bf16.msra.mxu0 %v3399_v5  ;;  %v3406_v5 = vld [vmem:[%s4286_s4 + $0x34] ss:$8 sps:$4 sm:$0xff]  }
 0xe7f   :  { %3217 = vmatprep.subr.bf16.mxu0 %v3536_v2  ;;  %1497 = vmatprep.subr.bf16.mxu1 %v3406_v5 }
 0xe80   :  { %1498 = vmatpush1.bf16.msra.mxu1 %v3404_v3 }
 0xe81   :  { %3223 = vmatprep.subr.bf16.mxu1 %v3536_v2 }
 0xe82   :  { %3218 = vmatpush3.bf16.msra.mxu0 %v3400_v8 }
 0xe83   :  { %3241 = vmatprep.subr.bf16.mxu0 %v3536_v2 }
 0xf43   :  { %v1287_v11 = vpop.f32.mrb[40].mxu1 }
 0xf44   :  { %v1288_v12 = vadd.f32 %v1287_v11, %v1237_v6  ;;  %v3201_v13 = vpop.f32.mrb[41].mxu1 }
 0xf45   :  { %v1290_v14 = vpop.f32.mrb[42].mxu1 }
 0xf46   :  { %v1296_v17 = vmul.f32 0.044715, %v1288_v12  ;;  %v1291_v23 = vadd.f32 %v1290_v14, %v1237_v6  ;;  %v3202_v24 = vpop.f32.mrb[43].mxu1  ;;  %v1294_v20 = vmul.f32 0.5, %v1288_v12 }
 0xf48   :  { %v1298_v26 = vmul.f32 %v1296_v17, %v1288_v12  ;;  %v1297_v19 = vmul.f32 0.044715, %v1291_v23  ;;  %v1295_v21 = vmul.f32 0.5, %v1291_v23  ;;  %v3992_v17 = vld [vmem:[%s4289_s7 + $0x8] sm:$0xff] }
 0xf4a   :  { %v1300_v27 = vmul.f32 %v1298_v26, %v1288_v12  ;;  %v1299_v28 = vmul.f32 %v1297_v19, %v1291_v23 }
 0xf4c   :  { %v1302_v18 = vadd.f32 %v1300_v27, %v1288_v12  ;;  %v1301_v32 = vmul.f32 %v1299_v28, %v1291_v23 }
 0xf4e   :  { %v1304_v34 = vmul.f32 0.7978846, %v1302_v18  ;;  %v1303_v35 = vadd.f32 %v1301_v32, %v1291_v23  ;;  %v1457_v23 = vrot.slane %v3992_v17, %v3676_v46  ;;  %v1463_v18 = vrot.slane %v3992_v17, %v3686_v51 }
 0xf50   :  { %3459 = vtanh.f32 %v1304_v34  ;;  %v1305_v36 = vmul.f32 0.7978846, %v1303_v35 }
 0xf52   :  { %3461 = vtanh.f32 %v1305_v36 }
 0xf5a   :  { %v3460_v37 = vpop.eup %3459 }
 0xf5b   :  { %v1308_v30 = vadd.f32 1.0, %v3460_v37  ;;  %v1541_v37 = vrot.slane %v3992_v17, %v289_v60 }
 0xf5c   :  { %v3462_v38 = vpop.eup %3461 }
 0xf5d   :  { %v1309_v22 = vadd.f32 1.0, %v3462_v38  ;;  %v1310_v39 = vmul.f32 %v1308_v30, %v1294_v20 }
 0xf5f   :  { %v1311_v40 = vmul.f32 %v1309_v22, %v1295_v21 }
 0xf61   :  { %v1312_v41 = vpack.c.bf16 %v1311_v40, %v1310_v39 }
 0xf63   :  { %3220 = vmatmul.mubr.bf16.vlgmr.msra.gmra.mrb[32].mxu0 %v1312_v41 }
 0xf64   :  { %3243 = vmatprep.mubr.msk.bf16.mxu0 %vm3537_vm0, %v3536_v2 }
0x1036   :  { %v1411_v25 = vpop.f32.mrb[32].mxu0 }
0x1037   :  { %v1418_v43 = vadd.f32 %v1411_v25, %v3887_v16  ;;  %v3221_v44 = vpop.f32.mrb[33].mxu0 }
0x1038   :  { %v1414_v49 = vpop.f32.mrb[34].mxu0 }
0x1039   :  { %v3963_v50 = vadd.f32 %v1423_v29, %v1418_v43  ;;  %v1419_v52 = vadd.f32 %v1414_v49, %v3893_v31  ;;  %v3222_v54 = vpop.f32.mrb[35].mxu0 }
0x103b   :  { %v3966_v55 = vadd.f32 %v1423_v29, %v1419_v52  ;;  %v1428_v56 = vsel %vm176_vm4, %v3963_v50, 0.0 }
0x103c   :  { %1429 = vadd.xlane.f32.xlu0 %v1428_v56 }
0x103d   :  { %v1431_v57 = vsel %vm176_vm4, %v3966_v55, 0.0 }
0x103e   :  { %1432 = vadd.xlane.f32.xlu1 %v1431_v57 }
0x10c9   :  { %v1430_v47 = vpop.xlane.xlu0 %1429 }
0x10ca   :  { %v1434_v58 = vmul.f32 0.03125, %v1430_v47 }
0x10cb   :  { %v1433_v16 = vpop.xlane.xlu1 %1432 }
0x10cc   :  { %v1436_v59 = vsub.f32 %v3963_v50, %v1434_v58  ;;  %v1435_v61 = vmul.f32 0.03125, %v1433_v16 }
0x10ce   :  { %v1437_v62 = vsub.f32 %v3966_v55, %v1435_v61  ;;  %v1438_v31 = vmul.f32 %v1436_v59, %v1436_v59 }
0x10d0   :  { %v1440_v63 = vsel %vm176_vm4, %v1438_v31, 0.0  ;;  %v1439_v0 = vmul.f32 %v1437_v62, %v1437_v62 }
0x10d1   :  { %1441 = vadd.xlane.f32.xlu0 %v1440_v63 }
0x10d2   :  { %v1443_v15 = vsel %vm176_vm4, %v1439_v0, 0.0 }
0x10d3   :  { %1444 = vadd.xlane.f32.xlu1 %v1443_v15 }
0x115e   :  { %v1442_v8 = vpop.xlane.xlu0 %1441 }
0x115f   :  { %v1446_v6 = vmul.f32 0.03125, %v1442_v8 }
0x1160   :  { %v1445_v11 = vpop.xlane.xlu1 %1444 }
0x1161   :  { %v1448_v12 = vadd.f32 1e-05, %v1446_v6  ;;  %v1447_v13 = vmul.f32 0.03125, %v1445_v11 }
0x1163   :  { %3463 = vrsqrt.f32 %v1448_v12  ;;  %v1449_v14 = vadd.f32 1e-05, %v1447_v13 }
0x1165   :  { %3465 = vrsqrt.f32 %v1449_v14 }
0x116d   :  { %v3464_v24 = vpop.eup %3463 }
0x116e   :  { %v1452_v26 = vmul.f32 %v3464_v24, %v1436_v59 }
0x116f   :  { %v3466_v19 = vpop.eup %3465 }
0x1170   :  { %v1458_v27 = vmul.f32 %v1457_v23, %v1452_v26  ;;  %v1453_v28 = vmul.f32 %v3466_v19, %v1437_v62 }
0x1172   :  { %v1459_v32 = vmul.f32 %v1457_v23, %v1453_v28  ;;  %v1464_v34 = vadd.f32 %v1463_v18, %v1458_v27 }
0x1174   :  { %v1465_v35 = vadd.f32 %v1463_v18, %v1459_v32 }
0x1176   :  { %v1466_v36 = vpack.c.bf16 %v1465_v35, %v1464_v34 }
0x1178   :  { %2936 = vmatmul.mubr.msk.bf16.vlgmr.msra.gmra.mrb[44].mxu1 %vm176_vm4, %v1466_v36 }
0x1179   :  { %3225 = vmatprep.mubr.msk.bf16.mxu1 %vm3537_vm0, %v3536_v2 }
0x124b   :  { %v1529_v30 = vpop.f32.mrb[44].mxu1 }
0x124c   :  { %v1531_v38 = vpop.f32.mrb[45].mxu1  ;;  %v4025_v52 = vpack.c.bf16 %v1529_v30, %v1529_v30 }
0x124d   :  { %v1542_v20 = vadd.f32 %v1541_v37, %v1531_v38  ;;  %v1533_v21 = vpop.f32.mrb[46].mxu1 }
0x124e   :  { %v4004_v22 = vpack.c.bf16 %v1533_v21, %v1533_v21  ;;  %v1535_v39 = vpop.f32.mrb[47].mxu1  ;;  %v1674_v54 = vsel %vm423_vm5, %v4025_v52, 0 }
0x124f   :  { %v4006_v40 = vpack.c.bf16 %v1542_v20, %v1542_v20  ;;  %v1543_v41 = vadd.f32 %v1541_v37, %v1535_v39 }
0x1250   :  { %v1720_v29 = vsel %vm423_vm5, %v4004_v22, 0 }
0x1251   :  { %v4010_v25 = vpack.c.bf16 %v1543_v41, %v1543_v41  ;;  %1547 = vrot.lane.b32.xlu0 %v4006_v40, %s3538_s16  ;;  %3242 = vmatpush3.bf16.msra.mxu0 %v1720_v29 }
0x1252   :  { %3253 = vmatprep.subr.bf16.mxu0 %v3536_v2 }
0x1253   :  { %1596 = vrot.lane.b32.xlu1 %v4010_v25, %s3538_s16 }
0x12c3   :  { %v1548_v60 = vpop.permute.xlu0 %1547 }
0x12c4   :  { %v1553_v43 = vsel %vm298_vm6, %v1548_v60, 0 }
0x12c5   :  { %3224 = vmatpush3.bf16.xpose.msra.mxu1 %v1553_v43  ;;  %v1597_v44 = vpop.permute.xlu1 %1596 }
0x12c6   :  { %3229 = vmatprep.subr.bf16.mxu1 %v3536_v2  ;;  %v1602_v49 = vsel %vm298_vm6, %v1597_v44, 0 }
0x12cc   :  { %3226 = vmatmul.mubr.msk.bf16.vlgmr.msra.gmra.mrb[48].mxu1 %vm298_vm6, %v4006_v40 }
0x12cd   :  { %3230 = vmatpush3.bf16.xpose.msra.mxu1 %v1602_v49  ;;  %3231 = vmatprep.mubr.msk.bf16.mxu1 %vm3537_vm0, %v3536_v2 }
0x12ce   :  { %3235 = vmatprep.subr.bf16.mxu1 %v3536_v2 }
0x12d4   :  { %3232 = vmatmul.mubr.msk.bf16.vlgmr.msra.gmra.mrb[52].mxu1 %vm298_vm6, %v4010_v25 }
0x12d5   :  { %3236 = vmatpush3.bf16.msra.mxu1 %v1674_v54  ;;  %3237 = vmatprep.mubr.msk.bf16.mxu1 %vm3537_vm0, %v3536_v2 }
0x12d6   :  { %3247 = vmatprep.subr.bf16.mxu1 %v3536_v2 }
0x139f   :  { %v1589_v56 = vpop.f32.mrb[48].mxu1 }
0x13a0   :  { %v1590_v57 = vadd.f32 %v1589_v56, %v3734_v33  ;;  %v3227_v47 = vpop.f32.mrb[49].mxu1 }
0x13a1   :  { %v1592_v58 = vpop.f32.mrb[50].mxu1 }
0x13a2   :  { %v3228_v16 = vpop.f32.mrb[51].mxu1  ;;  %v1644_v59 = vsel %vm298_vm6, %v1590_v57, -inf }
0x13a3   :  { %1645 = vmax.xlane.f32.xlu1 %v1644_v59 }
0x13a7   :  { %v1638_v61 = vpop.f32.mrb[52].mxu1 }
0x13a8   :  { %v1639_v62 = vadd.f32 %v1638_v61, %v3739_v9  ;;  %v3233_v31 = vpop.f32.mrb[53].mxu1 }
0x13a9   :  { %v1641_v63 = vpop.f32.mrb[54].mxu1 }
0x13aa   :  { %v3234_v0 = vpop.f32.mrb[55].mxu1  ;;  %v1647_v15 = vsel %vm298_vm6, %v1639_v62, -inf }
0x13ab   :  { %1648 = vmax.xlane.f32.xlu0 %v1647_v15 }
0x1430   :  { %v1646_v1 = vpop.xlane.xlu1 %1645 }
0x1431   :  { %v1650_v4 = vsub.f32 %v1590_v57, %v1646_v1 }
0x1433   :  { %v1652_v3 = vmul.f32 1.442695, %v1650_v4 }
0x1435   :  { %3467 = vpow2.f32 %v1652_v3 }
0x1438   :  { %v1649_v5 = vpop.xlane.xlu0 %1648 }
0x1439   :  { %v1651_v8 = vsub.f32 %v1639_v62, %v1649_v5 }
0x143b   :  { %v1654_v6 = vmul.f32 1.442695, %v1651_v8 }
0x143d   :  { %3469 = vpow2.f32 %v1654_v6 }
0x143f   :  { %v3468_v11 = vpop.eup %3467 }
0x1440   :  { %v1656_v12 = vsel %vm298_vm6, %v3468_v11, 0.0 }
0x1441   :  { %1657 = vadd.xlane.f32.xlu0 %v1656_v12 }
0x1447   :  { %v3470_v13 = vpop.eup %3469 }
0x1448   :  { %v1659_v14 = vsel %vm298_vm6, %v3470_v13, 0.0 }
0x1449   :  { %1660 = vadd.xlane.f32.xlu1 %v1659_v14 }
0x1457   :  { %1766 = vrot.lane.b32.xlu0 %v4006_v40, %s3541_s1 }
0x145a   :  { %1816 = vrot.lane.b32.xlu1 %v4010_v25, %s3541_s1 }
0x145b   :  { %1814 = vrot.lane.b32.xlu0 %v4010_v25, %s3542_s19 }
0x145e   :  { %1764 = vrot.lane.b32.xlu1 %v4006_v40, %s3542_s19 }
0x14ce   :  { %v1658_v23 = vpop.xlane.xlu0 %1657 }
0x14cf   :  { %3471 = vrcp.f32 %v1658_v23 }
0x14d2   :  { %v1767_v27 = vpop.permute.xlu0 %1766 }
0x14d3   :  { %v1772_v18 = vsel %vm298_vm6, %v1767_v27, 0 }
0x14d6   :  { %v1661_v24 = vpop.xlane.xlu1 %1660  ;;  %v1815_v38 = vpop.permute.xlu0 %1814 }
0x14d7   :  { %3473 = vrcp.f32 %v1661_v24 }
0x14d9   :  { %v3472_v26 = vpop.eup %3471 }
0x14da   :  { %v1664_v19 = vmul.f32 %v3472_v26, %v3468_v11  ;;  %v1817_v32 = vpop.permute.xlu1 %1816 }
0x14db   :  { %v1822_v30 = vsel %vm298_vm6, %v1817_v32, 0 }
0x14dc   :  { %v1666_v28 = vpack.c.bf16 %v1664_v19, %v1664_v19 }
0x14de   :  { %3238 = vmatmul.mubr.msk.bf16.vlgmr.msra.gmra.mrb[56].mxu1 %vm298_vm6, %v1666_v28  ;;  %v1765_v37 = vpop.permute.xlu1 %1764 }
0x14df   :  { %3248 = vmatpush3.bf16.xpose.msra.mxu1 %v1772_v18  ;;  %3249 = vmatprep.mubr.msk.bf16.mxu1 %vm3537_vm0, %v3536_v2 }
0x14e0   :  { %3259 = vmatprep.subr.bf16.mxu1 %v3536_v2 }
0x14e1   :  { %v3474_v34 = vpop.eup %3473 }
0x14e2   :  { %v1665_v35 = vmul.f32 %v3474_v34, %v3470_v13 }
0x14e4   :  { %v1667_v36 = vpack.c.bf16 %v1665_v35, %v1665_v35 }
0x14e6   :  { %3244 = vmatmul.mubr.msk.bf16.vlgmr.msra.gmra.mrb[36].mxu0 %vm298_vm6, %v1667_v36  ;;  %3250 = vmatmul.mubr.msk.bf16.vlgmr.msra.gmra.mrb[60].mxu1 %vm298_vm6, %v1765_v37 }
0x14e7   :  { %3254 = vmatpush3.bf16.xpose.msra.mxu0 %v1822_v30  ;;  %3255 = vmatprep.mubr.msk.bf16.mxu0 %vm3537_vm0, %v3536_v2 }
0x14e8   :  { %3265 = vmatprep.subr.bf16.mxu0 %v3536_v2  ;;  %3261 = vmatprep.mubr.msk.bf16.mxu1 %vm3537_vm0, %v3536_v2 }
0x14ee   :  { %3256 = vmatmul.mubr.msk.bf16.vlgmr.msra.gmra.mrb[40].mxu0 %vm298_vm6, %v1815_v38 }
0x14ef   :  { %3267 = vmatprep.mubr.msk.bf16.mxu0 %vm3537_vm0, %v3536_v2 }
0x15b1   :  { %v4064_v20 = vpop.f32.mrb[56].mxu1 }
0x15b2   :  { %v3239_v21 = vpop.f32.mrb[57].mxu1 }
0x15b3   :  { %v1713_v39 = vpop.f32.mrb[58].mxu1 }
0x15b4   :  { %v3240_v41 = vpop.f32.mrb[59].mxu1 }
0x15b9   :  { %v4066_v29 = vpop.f32.mrb[36].mxu0  ;;  %v1808_v60 = vpop.f32.mrb[60].mxu1 }
0x15ba   :  { %v1809_v43 = vadd.f32 %v1808_v60, %v3734_v33  ;;  %v3245_v44 = vpop.f32.mrb[37].mxu0  ;;  %v3251_v49 = vpop.f32.mrb[61].mxu1 }
0x15bb   :  { %v1759_v54 = vpop.f32.mrb[38].mxu0  ;;  %v1811_v56 = vpop.f32.mrb[62].mxu1 }
0x15bc   :  { %v3246_v57 = vpop.f32.mrb[39].mxu0  ;;  %v3252_v47 = vpop.f32.mrb[63].mxu1  ;;  %v1864_v58 = vsel %vm298_vm6, %v1809_v43, -inf }
0x15bd   :  { %1865 = vmax.xlane.f32.xlu1 %v1864_v58 }
0x15c1   :  { %v1858_v16 = vpop.f32.mrb[40].mxu0 }
0x15c2   :  { %v1859_v59 = vadd.f32 %v1858_v16, %v3739_v9  ;;  %v3257_v61 = vpop.f32.mrb[41].mxu0 }
0x15c3   :  { %v1861_v62 = vpop.f32.mrb[42].mxu0 }
0x15c4   :  { %v3258_v31 = vpop.f32.mrb[43].mxu0  ;;  %v1867_v63 = vsel %vm298_vm6, %v1859_v59, -inf }
0x15c5   :  { %1868 = vmax.xlane.f32.xlu0 %v1867_v63 }
0x15ce   :  { %1938 = vrot.lane.b32.xlu1 %v4004_v22, %s3538_s16 }
0x15db   :  { %1889 = vrot.lane.b32.xlu0 %v4025_v52, %s3538_s16 }
0x164a   :  { %v1866_v0 = vpop.xlane.xlu1 %1865 }
0x164b   :  { %v1870_v15 = vsub.f32 %v1809_v43, %v1866_v0 }
0x164d   :  { %v1872_v1 = vmul.f32 1.442695, %v1870_v15 }
0x164e   :  { %v1939_v4 = vpop.permute.xlu1 %1938 }
0x164f   :  { %3475 = vpow2.f32 %v1872_v1  ;;  %v1944_v3 = vsel %vm423_vm5, %v1939_v4, 0 }
0x1650   :  { %3266 = vmatpush3.bf16.msra.mxu0 %v1944_v3 }
0x1651   :  { %3277 = vmatprep.subr.bf16.mxu0 %v3536_v2 }
0x1652   :  { %v1869_v5 = vpop.xlane.xlu0 %1868 }
0x1653   :  { %v1871_v8 = vsub.f32 %v1859_v59, %v1869_v5 }
0x1655   :  { %v1874_v6 = vmul.f32 1.442695, %v1871_v8 }
0x1656   :  { %v1890_v11 = vpop.permute.xlu0 %1889 }
0x1657   :  { %3477 = vpow2.f32 %v1874_v6  ;;  %v1895_v12 = vsel %vm423_vm5, %v1890_v11, 0 }
0x1658   :  { %3260 = vmatpush3.bf16.msra.mxu1 %v1895_v12 }
0x1659   :  { %v3476_v13 = vpop.eup %3475  ;;  %3271 = vmatprep.subr.bf16.mxu1 %v3536_v2 }
0x165a   :  { %v1876_v14 = vsel %vm298_vm6, %v3476_v13, 0.0 }
0x165b   :  { %1877 = vadd.xlane.f32.xlu0 %v1876_v14 }
0x1661   :  { %v3478_v23 = vpop.eup %3477 }
0x1662   :  { %v1879_v24 = vsel %vm298_vm6, %v3478_v23, 0.0 }
0x1663   :  { %1880 = vadd.xlane.f32.xlu1 %v1879_v24 }
0x1671   :  { %2040 = vrot.lane.b32.xlu0 %v4010_v25, %s3543_s20 }
0x1674   :  { %1990 = vrot.lane.b32.xlu1 %v4006_v40, %s3543_s20 }
0x1675   :  { %2038 = vrot.lane.b32.xlu0 %v4010_v25, %s3544_s21 }
0x1678   :  { %1988 = vrot.lane.b32.xlu1 %v4006_v40, %s3544_s21 }
0x16e8   :  { %v1878_v26 = vpop.xlane.xlu0 %1877 }
0x16e9   :  { %3479 = vrcp.f32 %v1878_v26 }
0x16ec   :  { %v2041_v37 = vpop.permute.xlu0 %2040 }
0x16ed   :  { %v2046_v21 = vsel %vm298_vm6, %v2041_v37, 0 }
0x16f0   :  { %v1881_v19 = vpop.xlane.xlu1 %1880  ;;  %v2039_v39 = vpop.permute.xlu0 %2038 }
0x16f1   :  { %3481 = vrcp.f32 %v1881_v19 }
0x16f3   :  { %v3480_v27 = vpop.eup %3479 }
0x16f4   :  { %v1884_v28 = vmul.f32 %v3480_v27, %v3476_v13  ;;  %v1991_v18 = vpop.permute.xlu1 %1990 }
0x16f5   :  { %v1996_v34 = vsel %vm298_vm6, %v1991_v18, 0 }
0x16f6   :  { %v1886_v32 = vpack.c.bf16 %v1884_v28, %v1884_v28 }
0x16f8   :  { %3262 = vmatmul.mubr.msk.bf16.vlgmr.msra.gmra.mrb[64].mxu1 %vm298_vm6, %v1886_v32  ;;  %v1989_v38 = vpop.permute.xlu1 %1988 }
0x16f9   :  { %3272 = vmatpush3.bf16.xpose.msra.mxu1 %v1996_v34  ;;  %3273 = vmatprep.mubr.msk.bf16.mxu1 %vm3537_vm0, %v3536_v2 }
0x16fa   :  { %3283 = vmatprep.subr.bf16.mxu1 %v3536_v2 }
0x16fb   :  { %v3482_v35 = vpop.eup %3481 }
0x16fc   :  { %v1885_v36 = vmul.f32 %v3482_v35, %v3478_v23 }
0x16fe   :  { %v1887_v30 = vpack.c.bf16 %v1885_v36, %v1885_v36 }
0x1700   :  { %3268 = vmatmul.mubr.msk.bf16.vlgmr.msra.gmra.mrb[44].mxu0 %vm298_vm6, %v1887_v30  ;;  %3274 = vmatmul.mubr.msk.bf16.vlgmr.msra.gmra.mrb[68].mxu1 %vm298_vm6, %v1989_v38 }
0x1701   :  { %3278 = vmatpush3.bf16.xpose.msra.mxu0 %v2046_v21  ;;  %3279 = vmatprep.mubr.msk.bf16.mxu0 %vm3537_vm0, %v3536_v2 }
0x1702   :  { %3289 = vmatprep.subr.bf16.mxu0 %v3536_v2  ;;  %3285 = vmatprep.mubr.msk.bf16.mxu1 %vm3537_vm0, %v3536_v2 }
0x1708   :  { %3280 = vmatmul.mubr.msk.bf16.vlgmr.msra.gmra.mrb[48].mxu0 %vm298_vm6, %v2039_v39 }
0x1709   :  { %3291 = vmatprep.mubr.msk.bf16.mxu0 %vm3537_vm0, %v3536_v2 }
0x17cb   :  { %v1931_v41 = vpop.f32.mrb[64].mxu1 }
0x17cc   :  { %v4107_v60 = vadd.f32 %v1931_v41, %v4064_v20  ;;  %v3263_v43 = vpop.f32.mrb[65].mxu1 }
0x17cd   :  { %v1934_v44 = vpop.f32.mrb[66].mxu1 }
0x17ce   :  { %v3264_v49 = vpop.f32.mrb[67].mxu1 }
0x17d3   :  { %v1980_v54 = vpop.f32.mrb[44].mxu0  ;;  %v2032_v56 = vpop.f32.mrb[68].mxu1 }
0x17d4   :  { %v4110_v57 = vadd.f32 %v1980_v54, %v4066_v29  ;;  %v2033_v47 = vadd.f32 %v2032_v56, %v3734_v33  ;;  %v3269_v58 = vpop.f32.mrb[45].mxu0  ;;  %v3275_v16 = vpop.f32.mrb[69].mxu1 }
0x17d5   :  { %v1983_v59 = vpop.f32.mrb[46].mxu0  ;;  %v2035_v61 = vpop.f32.mrb[70].mxu1 }
0x17d6   :  { %v3270_v62 = vpop.f32.mrb[47].mxu0  ;;  %v3276_v31 = vpop.f32.mrb[71].mxu1  ;;  %v2088_v63 = vsel %vm298_vm6, %v2033_v47, -inf }
0x17d7   :  { %2089 = vmax.xlane.f32.xlu1 %v2088_v63 }
0x17db   :  { %v2082_v20 = vpop.f32.mrb[48].mxu0 }
0x17dc   :  { %v2083_v0 = vadd.f32 %v2082_v20, %v3739_v9  ;;  %v3281_v15 = vpop.f32.mrb[49].mxu0 }
0x17dd   :  { %v2085_v1 = vpop.f32.mrb[50].mxu0 }
0x17de   :  { %v3282_v4 = vpop.f32.mrb[51].mxu0  ;;  %v2091_v29 = vsel %vm298_vm6, %v2083_v0, -inf }
0x17df   :  { %2092 = vmax.xlane.f32.xlu0 %v2091_v29 }
0x17e8   :  { %2160 = vrot.lane.b32.xlu1 %v4004_v22, %s3545_s22 }
0x17f5   :  { %2112 = vrot.lane.b32.xlu0 %v4025_v52, %s3545_s22 }
0x1864   :  { %v2090_v3 = vpop.xlane.xlu1 %2089 }
0x1865   :  { %v2094_v5 = vsub.f32 %v2033_v47, %v2090_v3 }
0x1867   :  { %v2096_v8 = vmul.f32 1.442695, %v2094_v5 }
0x1868   :  { %v2161_v6 = vpop.permute.xlu1 %2160 }
0x1869   :  { %3483 = vpow2.f32 %v2096_v8  ;;  %v2166_v11 = vsel %vm423_vm5, %v2161_v6, 0 }
0x186a   :  { %3290 = vmatpush3.bf16.msra.mxu0 %v2166_v11 }
0x186b   :  { %3301 = vmatprep.subr.bf16.mxu0 %v3536_v2 }
0x186c   :  { %v2093_v12 = vpop.xlane.xlu0 %2092 }
0x186d   :  { %v2095_v13 = vsub.f32 %v2083_v0, %v2093_v12 }
0x186f   :  { %v2098_v14 = vmul.f32 1.442695, %v2095_v13 }
0x1870   :  { %v2113_v23 = vpop.permute.xlu0 %2112 }
0x1871   :  { %3485 = vpow2.f32 %v2098_v14  ;;  %v2118_v24 = vsel %vm423_vm5, %v2113_v23, 0 }
0x1872   :  { %3284 = vmatpush3.bf16.msra.mxu1 %v2118_v24 }
0x1873   :  { %v3484_v26 = vpop.eup %3483  ;;  %3295 = vmatprep.subr.bf16.mxu1 %v3536_v2 }
0x1874   :  { %v2100_v19 = vsel %vm298_vm6, %v3484_v26, 0.0 }
0x1875   :  { %2101 = vadd.xlane.f32.xlu0 %v2100_v19 }
0x187b   :  { %v3486_v27 = vpop.eup %3485 }
0x187c   :  { %v2103_v28 = vsel %vm298_vm6, %v3486_v27, 0.0 }
0x187d   :  { %2104 = vadd.xlane.f32.xlu1 %v2103_v28 }
0x188b   :  { %2262 = vrot.lane.b32.xlu0 %v4010_v25, %s3546_s0 }
0x188e   :  { %2212 = vrot.lane.b32.xlu1 %v4006_v40, %s3546_s0 }
0x188f   :  { %2260 = vrot.lane.b32.xlu0 %v4010_v25, %s3547_s23 }
0x1892   :  { %2210 = vrot.lane.b32.xlu1 %v4006_v40, %s3547_s23 }
0x1902   :  { %v2102_v18 = vpop.xlane.xlu0 %2101 }
0x1903   :  { %3487 = vrcp.f32 %v2102_v18 }
0x1906   :  { %v2263_v38 = vpop.permute.xlu0 %2262 }
0x1907   :  { %v2268_v41 = vsel %vm298_vm6, %v2263_v38, 0 }
0x190a   :  { %v2105_v32 = vpop.xlane.xlu1 %2104  ;;  %v2261_v43 = vpop.permute.xlu0 %2260 }
0x190b   :  { %3489 = vrcp.f32 %v2105_v32 }
0x190d   :  { %v3488_v34 = vpop.eup %3487 }
0x190e   :  { %v2108_v35 = vmul.f32 %v3488_v34, %v3484_v26  ;;  %v2213_v36 = vpop.permute.xlu1 %2212 }
0x190f   :  { %v2218_v30 = vsel %vm298_vm6, %v2213_v36, 0 }
0x1910   :  { %v2110_v37 = vpack.c.bf16 %v2108_v35, %v2108_v35 }
0x1912   :  { %3286 = vmatmul.mubr.msk.bf16.vlgmr.msra.gmra.mrb[72].mxu1 %vm298_vm6, %v2110_v37  ;;  %v2211_v39 = vpop.permute.xlu1 %2210 }
0x1913   :  { %3296 = vmatpush3.bf16.xpose.msra.mxu1 %v2218_v30  ;;  %3297 = vmatprep.mubr.msk.bf16.mxu1 %vm3537_vm0, %v3536_v2 }
0x1914   :  { %3307 = vmatprep.subr.bf16.mxu1 %v3536_v2 }
0x1915   :  { %v3490_v25 = vpop.eup %3489 }
0x1916   :  { %v2109_v40 = vmul.f32 %v3490_v25, %v3486_v27 }
0x1918   :  { %v2111_v21 = vpack.c.bf16 %v2109_v40, %v2109_v40  ;;  %v2437_v40 = vrot.slane %v3992_v17, %v1187_v7 }
0x191a   :  { %3292 = vmatmul.mubr.msk.bf16.vlgmr.msra.gmra.mrb[52].mxu0 %vm298_vm6, %v2111_v21  ;;  %3298 = vmatmul.mubr.msk.bf16.vlgmr.msra.gmra.mrb[76].mxu1 %vm298_vm6, %v2211_v39 }
0x191b   :  { %3302 = vmatpush3.bf16.xpose.msra.mxu0 %v2268_v41  ;;  %3303 = vmatprep.mubr.msk.bf16.mxu0 %vm3537_vm0, %v3536_v2 }
0x191c   :  { %3313 = vmatprep.subr.bf16.mxu0 %v3536_v2  ;;  %3309 = vmatprep.mubr.msk.bf16.mxu1 %vm3537_vm0, %v3536_v2 }
0x1922   :  { %3304 = vmatmul.mubr.msk.bf16.vlgmr.msra.gmra.mrb[56].mxu0 %vm298_vm6, %v2261_v43 }
0x1923   :  { %3315 = vmatprep.mubr.msk.bf16.mxu0 %vm3537_vm0, %v3536_v2 }
0x19e5   :  { %v2154_v44 = vpop.f32.mrb[72].mxu1 }
0x19e6   :  { %v2208_v49 = vadd.f32 %v2154_v44, %v4107_v60  ;;  %v3287_v54 = vpop.f32.mrb[73].mxu1 }
0x19e7   :  { %v2157_v56 = vpop.f32.mrb[74].mxu1 }
0x19e8   :  { %v3288_v47 = vpop.f32.mrb[75].mxu1 }
0x19ed   :  { %v2202_v58 = vpop.f32.mrb[52].mxu0  ;;  %v2254_v16 = vpop.f32.mrb[76].mxu1 }
0x19ee   :  { %v4152_v59 = vadd.f32 %v2202_v58, %v4110_v57  ;;  %v2255_v61 = vadd.f32 %v2254_v16, %v3734_v33  ;;  %v3293_v62 = vpop.f32.mrb[53].mxu0  ;;  %v3299_v31 = vpop.f32.mrb[77].mxu1 }
0x19ef   :  { %v2205_v63 = vpop.f32.mrb[54].mxu0  ;;  %v2257_v20 = vpop.f32.mrb[78].mxu1 }
0x19f0   :  { %v3294_v0 = vpop.f32.mrb[55].mxu0  ;;  %v3300_v15 = vpop.f32.mrb[79].mxu1  ;;  %v2310_v1 = vsel %vm298_vm6, %v2255_v61, -inf }
0x19f1   :  { %2311 = vmax.xlane.f32.xlu1 %v2310_v1 }
0x19f5   :  { %v2304_v60 = vpop.f32.mrb[56].mxu0 }
0x19f6   :  { %v2305_v4 = vadd.f32 %v2304_v60, %v3739_v9  ;;  %v3305_v29 = vpop.f32.mrb[57].mxu0  ;;  %v3407_v60 = vld [vmem:[%s4287_s5 + $0x10] sm:$0xff]  }
0x19f7   :  { %v2307_v3 = vpop.f32.mrb[58].mxu0 }
0x19f8   :  { %v3306_v5 = vpop.f32.mrb[59].mxu0  ;;  %v2313_v57 = vsel %vm298_vm6, %v2305_v4, -inf }
0x19f9   :  { %2314 = vmax.xlane.f32.xlu0 %v2313_v57 }
0x1a7e   :  { %v2312_v8 = vpop.xlane.xlu1 %2311 }
0x1a7f   :  { %v2316_v33 = vsub.f32 %v2255_v61, %v2312_v8 }
0x1a81   :  { %v2318_v6 = vmul.f32 1.442695, %v2316_v33 }
0x1a83   :  { %3491 = vpow2.f32 %v2318_v6 }
0x1a86   :  { %v2315_v11 = vpop.xlane.xlu0 %2314 }
0x1a87   :  { %v2317_v12 = vsub.f32 %v2305_v4, %v2315_v11  ;;  %v3408_v4 = vld [vmem:[%s4287_s5 + $0x18] sm:$0xff]   ;;  %v2469_v11 = vrot.slane %v3992_v17, %v3909_v48 }
0x1a89   :  { %v2320_v13 = vmul.f32 1.442695, %v2317_v12 }
0x1a8b   :  { %3493 = vpow2.f32 %v2320_v13 }
0x1a8d   :  { %v3492_v14 = vpop.eup %3491 }
0x1a8e   :  { %v2322_v23 = vsel %vm298_vm6, %v3492_v14, 0.0 }
0x1a8f   :  { %2323 = vadd.xlane.f32.xlu0 %v2322_v23 }
0x1a95   :  { %v3494_v24 = vpop.eup %3493 }
0x1a96   :  { %v2325_v9 = vsel %vm298_vm6, %v3494_v24, 0.0 }
0x1a97   :  { %2326 = vadd.xlane.f32.xlu1 %v2325_v9 }
0x1aa5   :  { %2334 = vrot.lane.b32.xlu0 %v4025_v52, %s3548_s2 }
0x1aa8   :  { %2382 = vrot.lane.b32.xlu1 %v4004_v22, %s3548_s2 }
0x1b1c   :  { %v2324_v26 = vpop.xlane.xlu0 %2323 }
0x1b1d   :  { %3495 = vrcp.f32 %v2324_v26 }
0x1b20   :  { %v2335_v19 = vpop.permute.xlu0 %2334 }
0x1b21   :  { %v2340_v27 = vsel %vm423_vm5, %v2335_v19, 0 }
0x1b22   :  { %3308 = vmatpush3.bf16.msra.mxu1 %v2340_v27 }
0x1b23   :  { %3319 = vmatprep.subr.bf16.mxu1 %v3536_v2 }
0x1b24   :  { %v2327_v28 = vpop.xlane.xlu1 %2326 }
0x1b25   :  { %3497 = vrcp.f32 %v2327_v28  ;;  %v3409_v28 = vld [vmem:[%s4288_s6 + $0x40] sm:$0xff]  }
0x1b27   :  { %v3496_v18 = vpop.eup %3495 }
0x1b28   :  { %v2330_v32 = vmul.f32 %v3496_v18, %v3492_v14  ;;  %v2383_v34 = vpop.permute.xlu1 %2382  ;;  %v3410_v18 = vld [vmem:[%s4288_s6 + $0x48] sm:$0xff]  }
0x1b29   :  { %v2388_v35 = vsel %vm423_vm5, %v2383_v34, 0  ;;  %v3412_v34 = vld [vmem:[%s4288_s6 + $0x58] sm:$0xff]  }
0x1b2a   :  { %3314 = vmatpush3.bf16.msra.mxu0 %v2388_v35  ;;  %v2332_v52 = vpack.c.bf16 %v2330_v32, %v2330_v32  ;;  %v3411_v32 = vld [vmem:[%s4288_s6 + $0x50] sm:$0xff]   ;;  %v3413_v35 = vld [vmem:[%s4288_s6 + $0x60] sm:$0xff]  }
0x1b2b   :  { %3327 = vmatprep.subr.bf16.mxu0 %v3536_v2 }
0x1b2c   :  { %3310 = vmatmul.mubr.msk.bf16.vlgmr.msra.gmra.mrb[80].mxu1 %vm298_vm6, %v2332_v52  ;;  %v3414_v52 = vld [vmem:[%s4288_s6 + $0x68] sm:$0xff]  }
0x1b2d   :  { %3323 = vmatprep.mubr.msk.bf16.mxu1 %vm3537_vm0, %v3536_v2  ;;  %3320 = vmatpush3.bf16.msra.mxu1 %v3407_v60 }
0x1b2e   :  { %3321 = vmatprep.subr.bf16.mxu1 %v3536_v2 }
0x1b2f   :  { %v3498_v22 = vpop.eup %3497 }
0x1b30   :  { %v2331_v36 = vmul.f32 %v3498_v22, %v3494_v24  ;;  %v2475_v24 = vrot.slane %v3992_v17, %v3914_v53  ;;  %v3415_v22 = vld [vmem:[%s4288_s6 + $0x70] sm:$0xff]  }
0x1b31   :  { %3322 = vmatpush3.bf16.msra.mxu1 %v3408_v4 }
0x1b32   :  { %v2333_v37 = vpack.c.bf16 %v2331_v36, %v2331_v36  ;;  %3347 = vmatprep.subr.bf16.mxu1 %v3536_v2  ;;  %v3416_v36 = vld [vmem:[%s4288_s6 + $0x78] sm:$0xff]  }
0x1b34   :  { %3316 = vmatmul.mubr.msk.bf16.vlgmr.msra.gmra.mrb[60].mxu0 %vm298_vm6, %v2333_v37  ;;  %v2487_v37 = vrot.slane %v3992_v17, %v1236_v10 }
0x1b35   :  { %3343 = vmatprep.mubr.msk.bf16.mxu0 %vm3537_vm0, %v3536_v2  ;;  %3328 = vmatpush3.bf16.msra.mxu0 %v3409_v28  ;;  %v3418_v28 = vld [vmem:[%s4290_s8 + $0x8] sm:$0xff]  }
0x1b36   :  { %3329 = vmatprep.subr.bf16.mxu0 %v3536_v2 }
0x1b39   :  { %3330 = vmatpush3.bf16.msra.mxu0 %v3410_v18 }
0x1b3a   :  { %3331 = vmatprep.subr.bf16.mxu0 %v3536_v2 }
0x1b3d   :  { %3332 = vmatpush3.bf16.msra.mxu0 %v3411_v32 }
0x1b3e   :  { %3333 = vmatprep.subr.bf16.mxu0 %v3536_v2 }
0x1b41   :  { %3334 = vmatpush3.bf16.msra.mxu0 %v3412_v34 }
0x1b42   :  { %3335 = vmatprep.subr.bf16.mxu0 %v3536_v2 }
0x1b45   :  { %3336 = vmatpush3.bf16.msra.mxu0 %v3413_v35 }
0x1b46   :  { %3337 = vmatprep.subr.bf16.mxu0 %v3536_v2 }
0x1b49   :  { %3338 = vmatpush3.bf16.msra.mxu0 %v3414_v52 }
0x1b4a   :  { %3339 = vmatprep.subr.bf16.mxu0 %v3536_v2 }
0x1b4d   :  { %3340 = vmatpush3.bf16.msra.mxu0 %v3415_v22 }
0x1b4e   :  { %3341 = vmatprep.subr.bf16.mxu0 %v3536_v2 }
0x1b51   :  { %3342 = vmatpush3.bf16.msra.mxu0 %v3416_v36  ;;  %v2677_v36 = vld [vmem:[%s4291_s9] sm:$0xff]  ;;  %s3551_s9 = smov [#allocation2]  }
0x1b52   :  { %s2879_s18 = sshll.u32 %s3551_s9, 4  ;;  %s2880_s18 = int_to_ptr.vmem [resolvable:$true] %s2879_s18 }
0x1b53   :  { %s3511_s4 = scalar_lea.vmem %s2880_s18, 32  ;;  %p3516_p1 = scmp.lt.s32.totalorder %s2880_s18, %s2880_s18 }
0x1b54   :  { %p3512_p0 = scmp.ne.s32.totalorder %s2880_s18, %s3511_s4  ;;  %p3517_p2 = scmp.lt.s32.totalorder %s3511_s4, %s3511_s4 }
0x1b56   :  { %p3518_p3 = por %p3517_p2, %p3516_p1 }
0x1b58   :  { %p3519_p4 = pnand %p3518_p3, %p3512_p0 }
0x1bff   :  { %v2376_v30 = vpop.f32.mrb[80].mxu1 }
0x1c00   :  { %v2430_v25 = vadd.f32 %v2376_v30, %v2208_v49  ;;  %v3311_v38 = vpop.f32.mrb[81].mxu1 }
0x1c01   :  { %v2379_v21 = vpop.f32.mrb[82].mxu1 }
0x1c02   :  { %v2432_v39 = vadd.f32 %v2430_v25, %v3963_v50  ;;  %v3312_v41 = vpop.f32.mrb[83].mxu1 }
0x1c04   :  { %v4178_v43 = vadd.f32 %v2437_v40, %v2432_v39 }
0x1c06   :  { %v2440_v44 = vsel %vm176_vm4, %v4178_v43, 0.0 }
0x1c07   :  { %2441 = vadd.xlane.f32.xlu1 %v2440_v44  ;;  %v2424_v54 = vpop.f32.mrb[60].mxu0 }
0x1c08   :  { %v2431_v56 = vadd.f32 %v2424_v54, %v4152_v59  ;;  %v3317_v47 = vpop.f32.mrb[61].mxu0 }
0x1c09   :  { %v2427_v49 = vpop.f32.mrb[62].mxu0 }
0x1c0a   :  { %v2433_v58 = vadd.f32 %v2431_v56, %v3966_v55  ;;  %v3318_v16 = vpop.f32.mrb[63].mxu0 }
0x1c0c   :  { %v4184_v7 = vadd.f32 %v2437_v40, %v2433_v58 }
0x1c0e   :  { %v2443_v50 = vsel %vm176_vm4, %v4184_v7, 0.0 }
0x1c0f   :  { %2444 = vadd.xlane.f32.xlu0 %v2443_v50 }
0x1c94   :  { %v2442_v61 = vpop.xlane.xlu1 %2441 }
0x1c95   :  { %v2446_v62 = vmul.f32 0.03125, %v2442_v61 }
0x1c97   :  { %v2448_v31 = vsub.f32 %v4178_v43, %v2446_v62 }
0x1c99   :  { %v2450_v63 = vmul.f32 %v2448_v31, %v2448_v31 }
0x1c9b   :  { %v2452_v20 = vsel %vm176_vm4, %v2450_v63, 0.0 }
0x1c9c   :  { %2453 = vadd.xlane.f32.xlu0 %v2452_v20  ;;  %v2445_v59 = vpop.xlane.xlu0 %2444 }
0x1c9d   :  { %v2447_v0 = vmul.f32 0.03125, %v2445_v59 }
0x1c9f   :  { %v2449_v15 = vsub.f32 %v4184_v7, %v2447_v0 }
0x1ca1   :  { %v2451_v55 = vmul.f32 %v2449_v15, %v2449_v15 }
0x1ca3   :  { %v2455_v1 = vsel %vm176_vm4, %v2451_v55, 0.0 }
0x1ca4   :  { %2456 = vadd.xlane.f32.xlu1 %v2455_v1  ;;  %v2674_v1 = vrot.slane %v3992_v17, %v1422_v42 }
0x1d29   :  { %v2454_v29 = vpop.xlane.xlu0 %2453 }
0x1d2a   :  { %v2458_v3 = vmul.f32 0.03125, %v2454_v29 }
0x1d2c   :  { %v2460_v5 = vadd.f32 1e-05, %v2458_v3 }
0x1d2e   :  { %3499 = vrsqrt.f32 %v2460_v5 }
0x1d31   :  { %v2457_v57 = vpop.xlane.xlu1 %2456 }
0x1d32   :  { %v2459_v8 = vmul.f32 0.03125, %v2457_v57 }
0x1d34   :  { %v2461_v33 = vadd.f32 1e-05, %v2459_v8 }
0x1d36   :  { %3501 = vrsqrt.f32 %v2461_v33 }
0x1d38   :  { %v3500_v6 = vpop.eup %3499 }
0x1d39   :  { %v2464_v12 = vmul.f32 %v3500_v6, %v2448_v31 }
0x1d3b   :  { %v2470_v14 = vmul.f32 %v2469_v11, %v2464_v12 }
0x1d3d   :  { %v2476_v26 = vadd.f32 %v2475_v24, %v2470_v14 }
0x1d40   :  { %v3502_v13 = vpop.eup %3501 }
0x1d41   :  { %v2465_v23 = vmul.f32 %v3502_v13, %v2449_v15 }
0x1d43   :  { %v2471_v9 = vmul.f32 %v2469_v11, %v2465_v23 }
0x1d45   :  { %v2477_v19 = vadd.f32 %v2475_v24, %v2471_v9 }
0x1d47   :  { %v2478_v27 = vpack.c.bf16 %v2477_v19, %v2476_v26 }
0x1d49   :  { %3324 = vmatmul.mubr.msk.bf16.vlgmr.msra.gmra.mrb[84].mxu1 %vm176_vm4, %v2478_v27  ;;  %v3417_v27 = vld [vmem:[%s4290_s8] sm:$0xff]   ;;  %s3550_s8 = smov 126  }
0x1d4a   :  { %3351 = vmatprep.mubr.msk.bf16.mxu1 %vm3537_vm0, %v3536_v2  ;;  %3348 = vmatpush3.bf16.msra.mxu1 %v3417_v27 }
0x1d4b   :  { %3349 = vmatprep.subr.bf16.mxu1 %v3536_v2 }
0x1d4e   :  { %3350 = vmatpush3.bf16.msra.mxu1 %v3418_v28 }
0x1d4f   :  { %3355 = vmatprep.subr.bf16.mxu1 %v3536_v2 }
0x1e1c   :  { %v2537_v30 = vpop.f32.mrb[84].mxu1 }
0x1e1d   :  { %v2538_v25 = vadd.f32 %v2537_v30, %v2487_v37  ;;  %v3325_v40 = vpop.f32.mrb[85].mxu1 }
0x1e1e   :  { %v2540_v38 = vpop.f32.mrb[86].mxu1 }
0x1e1f   :  { %v2546_v21 = vmul.f32 0.044715, %v2538_v25  ;;  %v2541_v39 = vadd.f32 %v2540_v38, %v2487_v37  ;;  %v3326_v41 = vpop.f32.mrb[87].mxu1  ;;  %v2544_v63 = vmul.f32 0.5, %v2538_v25  ;;  %v2735_v38 = vrot.slane %v2677_v36, %v3686_v51 }
0x1e21   :  { %v2548_v44 = vmul.f32 %v2546_v21, %v2538_v25  ;;  %v2547_v54 = vmul.f32 0.044715, %v2541_v39  ;;  %v2545_v20 = vmul.f32 0.5, %v2541_v39 }
0x1e23   :  { %v2550_v56 = vmul.f32 %v2548_v44, %v2538_v25  ;;  %v2549_v47 = vmul.f32 %v2547_v54, %v2541_v39 }
0x1e25   :  { %v2552_v49 = vadd.f32 %v2550_v56, %v2538_v25  ;;  %v2551_v58 = vmul.f32 %v2549_v47, %v2541_v39  ;;  %v2729_v25 = vrot.slane %v2677_v36, %v3676_v46 }
0x1e27   :  { %v2554_v16 = vmul.f32 0.7978846, %v2552_v49  ;;  %v2553_v50 = vadd.f32 %v2551_v58, %v2541_v39 }
0x1e29   :  { %3503 = vtanh.f32 %v2554_v16  ;;  %v2555_v61 = vmul.f32 0.7978846, %v2553_v50 }
0x1e2b   :  { %3505 = vtanh.f32 %v2555_v61 }
0x1e33   :  { %v3504_v62 = vpop.eup %3503 }
0x1e34   :  { %v2558_v10 = vadd.f32 1.0, %v3504_v62 }
0x1e35   :  { %v3506_v31 = vpop.eup %3505 }
0x1e36   :  { %v2559_v59 = vadd.f32 1.0, %v3506_v31  ;;  %v2560_v0 = vmul.f32 %v2558_v10, %v2544_v63  ;;  %v2747_v31 = vrot.slane %v2677_v36, %v3909_v48 }
0x1e38   :  { %v2561_v15 = vmul.f32 %v2559_v59, %v2545_v20 }
0x1e3a   :  { %v2562_v55 = vpack.c.bf16 %v2561_v15, %v2560_v0 }
0x1e3c   :  { %3344 = vmatmul.mubr.bf16.vlgmr.msra.gmra.mrb[64].mxu0 %v2562_v55 }
0x1f0f   :  { %v2662_v60 = vpop.f32.mrb[64].mxu0 }
0x1f10   :  { %v2669_v4 = vadd.f32 %v2662_v60, %v4178_v43  ;;  %v3345_v29 = vpop.f32.mrb[65].mxu0 }
0x1f11   :  { %v2665_v3 = vpop.f32.mrb[66].mxu0 }
0x1f12   :  { %v2670_v5 = vadd.f32 %v2665_v3, %v4184_v7  ;;  %v3346_v57 = vpop.f32.mrb[67].mxu0  ;;  %v2675_v8 = vadd.f32 %v2674_v1, %v2669_v4  ;;  %v2817_v4 = vrot.slane %v2677_v36, %v3914_v53 }
0x1f14   :  { %v2676_v33 = vadd.f32 %v2674_v1, %v2670_v5  ;;  %v2684_v6 = vsel %vm2683_vm8, %v2675_v8, 0.0 }
0x1f15   :  { %2685 = vadd.xlane.f32.xlu1 %v2684_v6 }
0x1f16   :  { %v2680_v11 = vrot.slane %v2676_v33, 7 }
0x1f18   :  { %v2688_v45 = vsel %vm2687_vm9, %v2680_v11, 0.0 }
0x1f19   :  { %2689 = vadd.xlane.f32.xlu0 %v2688_v45 }
0x1fa2   :  { %v2686_v42 = vpop.xlane.xlu1 %2685 }
0x1fa3   :  { %v2691_v17 = vmul.f32 0.03125, %v2686_v42 }
0x1fa5   :  { %v2698_v12 = vsub.f32 %v2675_v8, %v2691_v17 }
0x1fa6   :  { %v2690_v43 = vpop.xlane.xlu0 %2689 }
0x1fa7   :  { %v2692_v13 = vmul.f32 0.03125, %v2690_v43  ;;  %v2700_v14 = vmul.f32 %v2698_v12, %v2698_v12 }
0x1fa9   :  { %v2695_v23 = vrot.slane %v2692_v13, 1  ;;  %v2707_v7 = vsel %vm2683_vm8, %v2700_v14, 0.0 }
0x1faa   :  { %2708 = vadd.xlane.f32.xlu1 %v2707_v7 }
0x1fab   :  { %v2699_v24 = vsub.f32 %v2676_v33, %v2695_v23 }
0x1fad   :  { %v2701_v9 = vmul.f32 %v2699_v24, %v2699_v24 }
0x1faf   :  { %v2704_v26 = vrot.slane %v2701_v9, 7 }
0x1fb1   :  { %v2710_v19 = vsel %vm2687_vm9, %v2704_v26, 0.0 }
0x1fb2   :  { %2711 = vadd.xlane.f32.xlu0 %v2710_v19 }
0x1fbb   :  { %2823 = vrot.lane.b32.xlu1 %v3418_v28, %s3549_s14 }
0x1fc8   :  { %2821 = vrot.lane.b32.xlu0 %v3417_v27, %s3549_s14 }
0x2037   :  { %v2709_v18 = vpop.xlane.xlu1 %2708 }
0x2038   :  { %v2713_v32 = vmul.f32 0.03125, %v2709_v18 }
0x203a   :  { %v2715_v34 = vadd.f32 1e-05, %v2713_v32 }
0x203b   :  { %v2824_v51 = vpop.permute.xlu1 %2823 }
0x203c   :  { %3507 = vrsqrt.f32 %v2715_v34 }
0x203f   :  { %v2712_v35 = vpop.xlane.xlu0 %2711 }
0x2040   :  { %v2714_v52 = vmul.f32 0.03125, %v2712_v35 }
0x2042   :  { %v2716_v22 = vadd.f32 1e-05, %v2714_v52 }
0x2043   :  { %v2822_v46 = vpop.permute.xlu0 %2821 }
0x2044   :  { %3509 = vrsqrt.f32 %v2716_v22 }
0x2046   :  { %v3508_v37 = vpop.eup %3507 }
0x2047   :  { %v2724_v30 = vmul.f32 %v3508_v37, %v2698_v12 }
0x2049   :  { %v2730_v40 = vmul.f32 %v2729_v25, %v2724_v30 }
0x204b   :  { %v2736_v39 = vadd.f32 %v2735_v38, %v2730_v40 }
0x204d   :  { %v2742_v54 = vpack.c.bf16 %v2736_v39, %v2736_v39 }
0x204e   :  { %v3510_v21 = vpop.eup %3509 }
0x204f   :  { %v2721_v41 = vrot.slane %v3510_v21, 1  ;;  %v2750_v49 = vunpack.c.l.b16 %v2742_v54 }
0x2051   :  { %v2725_v44 = vmul.f32 %v2721_v41, %v2699_v24  ;;  %v2752_v50 = vrot.slane %v2750_v49, 7 }
0x2053   :  { %v2731_v56 = vmul.f32 %v2729_v25, %v2725_v44 }
0x2055   :  { %v2737_v47 = vadd.f32 %v2735_v38, %v2731_v56 }
0x2057   :  { %v2743_v58 = vpack.c.bf16 %v2737_v47, %v2737_v47 }
0x2059   :  { %v2751_v16 = vunpack.c.l.b16 %v2743_v58 }
0x205b   :  { %v2753_v61 = vrot.slane %v2751_v16, 6 }
0x205d   :  { %v2755_v62 = vsel %vm2754_vm10, %v2753_v61, %v2752_v50 }
0x205e   :  { %v2756_v10 = vpack.c.b16 %v2755_v62, %v2755_v62 }
0x2060   :  { %3352 = vmatmul.mubr.msk.bf16.vlgmr.msra.gmra.mrb[88].mxu1 %vm176_vm4, %v2756_v10 }
0x2061   :  { %3359 = vmatprep.mubr.msk.bf16.mxu1 %vm3537_vm0, %v3536_v2  ;;  %3356 = vmatpush3.bf16.msra.mxu1 %v2822_v46 }
0x2062   :  { %3357 = vmatprep.subr.bf16.mxu1 %v3536_v2 }
0x2065   :  { %3358 = vmatpush3.bf16.msra.mxu1 %v2824_v51 }
0x2133   :  { %v2806_v63 = vpop.f32.mrb[88].mxu1 }
0x2134   :  { %v2807_v20 = vadd.f32 %v2806_v63, %v2747_v31  ;;  %v3353_v59 = vpop.f32.mrb[89].mxu1 }
0x2135   :  { %v2809_v0 = vpop.f32.mrb[90].mxu1 }
0x2136   :  { %v2812_v15 = vmax.f32 %v2807_v20, 0.0  ;;  %v3354_v55 = vpop.f32.mrb[91].mxu1 }
0x2138   :  { %v2813_v1 = vpack.c.bf16 %v2812_v15, %v2812_v15 }
0x213a   :  { %2819 = vrot.lane.b32.xlu1 %v2813_v1, %s3550_s8 }
0x21ac   :  { %v2820_v60 = vpop.permute.xlu1 %2819 }
0x21ad   :  { %3360 = vmatmul.mubr.msk.bf16.vlgmr.msra.gmra.mrb[92].mxu1 %vm176_vm4, %v2820_v60 }
0x2280   :  { %v2864_v29 = vpop.f32.mrb[92].mxu1 }
0x2281   :  { %v2865_v2 = vadd.f32 %v2864_v29, %v2817_v4  ;;  %v3361_v3 = vpop.f32.mrb[93].mxu1 }
0x2282   :  { %v2867_v48 = vpop.f32.mrb[94].mxu1 }
0x2283   :  { %v2870_v5 = vadd.f32 %v2865_v2, %v2807_v20  ;;  %v3362_v57 = vpop.f32.mrb[95].mxu1 }
0x2285   :  { %2872 = vst.msk [vmem:[#allocation2] sm:$0x3] %vm2871_vm11, %v2870_v5 }
0x2286   :  { %3522 = shalt.err (!%p3519_p4)
}
0x2287   :  { %s3523_s1 = scalar_lea.hbm %s4292_s10, 32 }
0x2288   :  { %p3524_p5 = scmp.ne.s32.totalorder %s4292_s10, %s3523_s1  ;;  %p3527_p6 = scmp.lt.u32.totalorder %s3523_s1, %s4292_s10 }
0x228a   :  { %p3529_p7 = pnand %p3527_p6, %p3524_p5 }
0x228c   :  { %3532 = shalt.err (!%p3529_p7)
}
0x228d   :  { %2882 = dma.vmem_to_hbm [thread:$0]  %s2880_s18, 32, %s4292_s10, [#allocation3]  }
0x228e   :  { %3533 = dma.done.wait [#allocation3], 32  }
0x228f   :  { %3534 = vsyncadd [#allocation3], 4294967264 }
0x2290   :  { %2886 = vsyncpa [#allocation3], 1 }

</bundles_post_ra>
